<compile_context>
chip_gen: v7x
topology: tpu7x:2x2x1
jax: 0.10.0
libtpu: 0.0.40
codegen_flags: <defaults>
</compile_context>

<pallas_src>
import jax
import jax.numpy as jnp
import numpy as np
from jax.experimental import pallas as pl
from jax.experimental.pallas import tpu as pltpu


def _ode_rk4_kernel(dts_ref, y0_ref, w1_ref, b1_ref, w2_ref, b2_ref, out_ref):
    # dts_ref: VMEM [(T-1)*4, R, D] pre-scaled, pre-broadcast time coefficients
    #          (per step: [dt/2, dt, dt/6, dt/3]) for this row tile
    # y0_ref:  VMEM [R, D]          initial latent states (rows = batch*point)
    # w1/w2:   VMEM bf16 MLP weights; b1/b2: VMEM f32 biases
    # out_ref: VMEM [R, T, D]       trajectory for this row tile
    n_steps = dts_ref.shape[0] // 4          # T - 1 (static)
    rows, dim = y0_ref.shape
    hidden = w1_ref.shape[1]

    w1 = w1_ref[...]                         # already bf16 (cast once in wrapper)
    w2 = w2_ref[...]
    # Hoist the bias broadcasts out of the step loop (f() is called 4x/step;
    # JAX does not CSE broadcast_in_dim inside the unrolled body).
    b1 = jnp.broadcast_to(b1_ref[...], (rows, hidden))
    b2 = jnp.broadcast_to(b2_ref[...], (rows, dim))

    def f(y):
        # bf16 MXU inputs, f32 accumulate (single-pass vmatmul on the fully
        # serial k1->k2->k3->k4 chain).  tanh / adds stay f32 so the same code
        # is efficient on v5e (no bf16 VPU/EUP there).
        h = jnp.tanh(
            jnp.dot(y.astype(jnp.bfloat16), w1,
                    preferred_element_type=jnp.float32) + b1)
        return jnp.dot(h.astype(jnp.bfloat16), w2,
                       preferred_element_type=jnp.float32) + b2

    y = y0_ref[...]
    out_ref[:, 0, :] = y                     # odeint returns the initial point at t[0]

    # T-1 = 7: fully unrolled with static step indices.  Incremental
    # accumulation keeps only {y, k, acc} live (D=16 wastes 7/8 of each vreg's
    # lanes, so every extra live [R, D]/[R, H] array costs ~8x its natural size).
    for step in range(n_steps):
        base = 4 * step
        half_dt = dts_ref[base + 0]          # all pre-scaled & pre-broadcast [R, D]
        dt_full = dts_ref[base + 1]
        dt_6 = dts_ref[base + 2]
        dt_3 = dts_ref[base + 3]

        k = f(y)                             # k1
        acc = y + dt_6 * k
        k = f(y + half_dt * k)               # k2
        acc = acc + dt_3 * k
        k = f(y + half_dt * k)               # k3
        acc = acc + dt_3 * k
        k = f(y + dt_full * k)               # k4
        y = acc + dt_6 * k
        out_ref[:, step + 1, :] = y


def _vmem_bytes_estimate(T, row_tile, D, H, double_buffered):
    f32 = 4
    out_blk = row_tile * T * D * f32
    dts_blk = 4 * (T - 1) * row_tile * D * f32
    y0_blk = row_tile * D * f32
    weights = (D * H + H * D) * 2 + (H + D) * f32     # bf16 weights + f32 biases
    temps = 6 * row_tile * max(D, H) * f32            # live RK4 / MLP temporaries
    mult = 2 if double_buffered else 1                # Pallas double-buffers blocks
    return mult * (out_blk + dts_blk + y0_blk) + weights + temps


def _auto_row_tile(N, T, D, H):
    """Single tile on single-TC parts (v5e/v6e); >=2 tiles only on v7x so the
    'parallel' row axis feeds both TensorCores; shrink tile to fit VMEM."""
    try:
        kind = jax.devices()[0].device_kind.lower()
    except Exception:
        kind = ""
    two_tensorcores = "v7" in kind

    row_tile = N
    if two_tensorcores and N % 16 == 0 and N // 2 >= 128:
        row_tile = N // 2

    # Shrink until the per-tile footprint fits a conservative budget that works
    # with the default scoped VMEM limit on every generation (v7x: 64 MiB phys).
    budget = 24 * 1024 * 1024
    while _vmem_bytes_estimate(T, row_tile, D, H, row_tile != N) > budget:
        half = row_tile // 2
        if half % 8 != 0 or N % half != 0:
            break
        row_tile = half
    return row_tile


def diffeq_solver_forward(first_point, time_steps, params, row_tile=None):
    """Pallas implementation of DiffeqSolver.forward.

    first_point: [N, D] float32, N = B * P (batch-major rows, as in PyTorch)
    time_steps:  [T, B] float32
    returns:     [N, D, T] float32
    """
    w1, b1, w2, b2 = params
    T, B = time_steps.shape
    N, D = first_point.shape
    if N % B != 0:
        raise ValueError(f"len(first_point)={N} must be divisible by batch_size={B}")
    P = N // B
    H = w1.shape[1]

    if row_tile is None:
        row_tile = _auto_row_tile(N, T, D, H)
    if N % row_tile != 0:
        raise ValueError(f"row_tile={row_tile} must divide N={N}")
    if row_tile != N and row_tile % 8 != 0:
        raise ValueError(f"row_tile={row_tile} must be a multiple of 8 (sublane)")
    num_row_tiles = N // row_tile

    # Per-step time coefficients, pre-scaled (dt/2, dt, dt/6, dt/3), mapped to
    # rows (row n belongs to batch n // P, matching the PyTorch slicing) and
    # pre-broadcast over D so no broadcast / scalar multiply sits on the
    # kernel's serial per-step chain.
    dt_tb = time_steps[1:, :] - time_steps[:-1, :]                    # [T-1, B]
    coeffs = jnp.stack([0.5 * dt_tb, dt_tb, dt_tb / 6.0, dt_tb / 3.0],
                       axis=1).reshape((T - 1) * 4, B)                # [(T-1)*4, B]
    dts = jnp.repeat(coeffs, P, axis=1)[:, :, None]                   # [(T-1)*4, N, 1]
    dts = jnp.broadcast_to(dts, ((T - 1) * 4, N, D)).astype(jnp.float32)

    # Weights cast to bf16 once here (halves their DMA, no per-call in-kernel
    # cast); biases stay f32 (added to the f32 MXU accumulator).
    w1_bf16 = w1.astype(jnp.bfloat16)
    w2_bf16 = w2.astype(jnp.bfloat16)

    flops = 2 * 2 * 4 * (T - 1) * N * D * H            # 2 matmuls per f(), 4 f()/step
    transcendentals = 4 * (T - 1) * N * H              # tanh
    bytes_accessed = int((dts.size + first_point.size + b1.size + b2.size) * 4
                         + (w1.size + w2.size) * 2 + N * T * D * 4)

    est = _vmem_bytes_estimate(T, row_tile, D, H, num_row_tiles > 1)
    vmem_limit = (int(min(2 * est, 60 * 1024 * 1024))
                  if est > 12 * 1024 * 1024 else None)

    out_ntd = pl.pallas_call(
        _ode_rk4_kernel,
        out_shape=jax.ShapeDtypeStruct((N, T, D), jnp.float32),
        grid_spec=pltpu.PrefetchScalarGridSpec(
            num_scalar_prefetch=0,
            grid=(num_row_tiles,),
            in_specs=[
                pl.BlockSpec(((T - 1) * 4, row_tile, D), lambda r: (0, r, 0)),
                pl.BlockSpec((row_tile, D), lambda r: (r, 0)),
                pl.BlockSpec((D, H), lambda r: (0, 0)),
                pl.BlockSpec((1, H), lambda r: (0, 0)),
                pl.BlockSpec((H, D), lambda r: (0, 0)),
                pl.BlockSpec((1, D), lambda r: (0, 0)),
            ],
            out_specs=pl.BlockSpec((row_tile, T, D), lambda r: (r, 0, 0)),
        ),
        compiler_params=pltpu.CompilerParams(
            dimension_semantics=("parallel",),
            vmem_limit_bytes=vmem_limit,
        ),
        cost_estimate=pl.CostEstimate(
            flops=int(flops),
            transcendentals=int(transcendentals),
            bytes_accessed=bytes_accessed,
        ),
    )(dts, first_point, w1_bf16, b1, w2_bf16, b2)

    # The kernel emits [N, T, D] (contiguous per-row-tile writeback); this final
    # permute reproduces the module's [N, D, T] return layout.  Consumers that
    # can take [N, T, D] should skip it (it round-trips the trajectory through
    # HBM and puts tiny T=8 on the minor axis).
    return jnp.transpose(out_ntd, (0, 2, 1))


def _ref_forward(first_point, time_steps, params):
    """Pure-JAX reference: per-batch solve + stack/permute/reshape exactly like
    the PyTorch module, with the same bf16-input / f32-accumulate matmuls and
    the same incremental RK4 update as the kernel."""
    w1, b1, w2, b2 = params
    w1_bf16 = w1.astype(jnp.bfloat16)
    w2_bf16 = w2.astype(jnp.bfloat16)
    T, B = time_steps.shape
    N, D = first_point.shape
    P = N // B

    def f(y):
        h = jnp.tanh(jnp.dot(y.astype(jnp.bfloat16), w1_bf16,
                             preferred_element_type=jnp.float32) + b1)
        return jnp.dot(h.astype(jnp.bfloat16), w2_bf16,
                       preferred_element_type=jnp.float32) + b2

    def solve_one(y0, ts):
        ys = [y0]
        y = y0
        for s in range(T - 1):
            dt = ts[s + 1] - ts[s]
            half_dt, dt_6, dt_3 = 0.5 * dt, dt / 6.0, dt / 3.0
            k = f(y)                          # k1
            acc = y + dt_6 * k
            k = f(y + half_dt * k)            # k2
            acc = acc + dt_3 * k
            k = f(y + half_dt * k)            # k3
            acc = acc + dt_3 * k
            k = f(y + dt * k)                 # k4
            y = acc + dt_6 * k
            ys.append(y)
        return jnp.stack(ys, axis=0)          # [T, P, D]

    preds = [solve_one(first_point[i * P:(i + 1) * P], time_steps[:, i])
             for i in range(B)]
    pred = jnp.stack(preds)                                   # [B, T, P, D]
    pred = jnp.transpose(pred, (1, 0, 2, 3)).reshape(T, N, D)  # [T, N, D]
    return jnp.transpose(pred, (1, 2, 0))                      # [N, D, T]


if __name__ == "__main__":
    B, P, D, H, T = 2, 4, 16, 32, 8   # batch, points-per-batch, latent dim, ode hidden, time steps
    N = B * P

    key = jax.random.PRNGKey(0)
    key1, key2, key3, key4, key5 = jax.random.split(key, 5)
    w1 = jax.random.normal(key1, (D, H), jnp.float32) * 0.3
    b1 = jax.random.normal(key2, (1, H), jnp.float32) * 0.1
    w2 = jax.random.normal(key3, (H, D), jnp.float32) * 0.3
    b2 = jax.random.normal(key4, (1, D), jnp.float32) * 0.1
    params = (w1, b1, w2, b2)

    first_point = jax.random.normal(key5, (N, D), jnp.float32)
    time_steps = jnp.stack(
        [jnp.linspace(0.0, 1.0, T), jnp.linspace(0.0, 1.5, T)], axis=1
    ).astype(jnp.float32)  # [T, B]

    out = diffeq_solver_forward(first_point, time_steps, params)
    out = jax.block_until_ready(out)

    ref = _ref_forward(first_point, time_steps, params)
    assert out.shape == (N, D, T), out.shape
    np.testing.assert_allclose(np.asarray(out), np.asarray(ref), rtol=1e-3, atol=1e-4)

    print("KERNEL_OK")
</pallas_src>

<mosaic_0001>
module attributes {stable_mosaic.version = 11 : i64} {
  func.func @_ode_rk4_kernel(%arg0: i32, %arg1: memref<28x8x16xf32, #tpu.memory_space<vmem>>, %arg2: memref<8x16xf32, #tpu.memory_space<vmem>>, %arg3: memref<16x32xbf16, #tpu.memory_space<vmem>>, %arg4: memref<1x32xf32, #tpu.memory_space<vmem>>, %arg5: memref<32x16xbf16, #tpu.memory_space<vmem>>, %arg6: memref<1x16xf32, #tpu.memory_space<vmem>>, %arg7: memref<8x8x16xf32, #tpu.memory_space<vmem>>) attributes {dimension_semantics = [#tpu.dimension_semantics<parallel>], iteration_bounds = array<i64: 1>, scalar_prefetch = 0 : i64, scratch_operands = 0 : i64, tpu.core_type = #tpu.core_type<tc>, window_params = [{transform_indices = @transform_0, window_bounds = array<i64: 28, 8, 16>}, {transform_indices = @transform_1, window_bounds = array<i64: 8, 16>}, {pipeline_mode = #tpu.pipeline_mode<synchronous>, transform_indices = @transform_2, window_bounds = array<i64: 16, 32>}, {pipeline_mode = #tpu.pipeline_mode<synchronous>, transform_indices = @transform_3, window_bounds = array<i64: 1, 32>}, {pipeline_mode = #tpu.pipeline_mode<synchronous>, transform_indices = @transform_4, window_bounds = array<i64: 32, 16>}, {pipeline_mode = #tpu.pipeline_mode<synchronous>, transform_indices = @transform_5, window_bounds = array<i64: 1, 16>}, {transform_indices = @transform_6, window_bounds = array<i64: 8, 8, 16>}]} {
    %c0 = arith.constant 0 : index
    %c0_0 = arith.constant 0 : index
    %0 = vector.load %arg3[%c0, %c0_0] : memref<16x32xbf16, #tpu.memory_space<vmem>>, vector<16x32xbf16>
    %c0_1 = arith.constant 0 : index
    %c0_2 = arith.constant 0 : index
    %1 = vector.load %arg5[%c0_1, %c0_2] : memref<32x16xbf16, #tpu.memory_space<vmem>>, vector<32x16xbf16>
    %c0_3 = arith.constant 0 : index
    %c0_4 = arith.constant 0 : index
    %2 = vector.load %arg4[%c0_3, %c0_4] : memref<1x32xf32, #tpu.memory_space<vmem>>, vector<1x32xf32>
    %3 = vector.shape_cast %2 : vector<1x32xf32> to vector<1x32xf32>
    %4 = vector.broadcast %3 : vector<1x32xf32> to vector<8x32xf32>
    %c0_5 = arith.constant 0 : index
    %c0_6 = arith.constant 0 : index
    %5 = vector.load %arg6[%c0_5, %c0_6] : memref<1x16xf32, #tpu.memory_space<vmem>>, vector<1x16xf32>
    %6 = vector.shape_cast %5 : vector<1x16xf32> to vector<1x16xf32>
    %7 = vector.broadcast %6 : vector<1x16xf32> to vector<8x16xf32>
    %c0_7 = arith.constant 0 : index
    %c0_8 = arith.constant 0 : index
    %8 = vector.load %arg2[%c0_7, %c0_8] : memref<8x16xf32, #tpu.memory_space<vmem>>, vector<8x16xf32>
    %c0_9 = arith.constant 0 : index
    %c0_10 = arith.constant 0 : index
    %c0_11 = arith.constant 0 : index
    %9 = vector.load %arg7[%c0_9, %c0_10, %c0_11] : memref<8x8x16xf32, #tpu.memory_space<vmem>>, vector<8x1x16xf32>
    %10 = vector.shape_cast %9 : vector<8x1x16xf32> to vector<8x16xf32>
    %11 = vector.shape_cast %8 : vector<8x16xf32> to vector<8x1x16xf32>
    tpu.vector_store %arg7[%c0_9, %c0_10, %c0_11], %11 {strides = array<i32>} : memref<8x8x16xf32, #tpu.memory_space<vmem>>, vector<8x1x16xf32>,
    %c0_12 = arith.constant 0 : index
    %c0_13 = arith.constant 0 : index
    %c0_14 = arith.constant 0 : index
    %12 = vector.load %arg1[%c0_12, %c0_13, %c0_14] : memref<28x8x16xf32, #tpu.memory_space<vmem>>, vector<1x8x16xf32>
    %13 = vector.shape_cast %12 : vector<1x8x16xf32> to vector<8x16xf32>
    %c1 = arith.constant 1 : index
    %c0_15 = arith.constant 0 : index
    %c0_16 = arith.constant 0 : index
    %14 = vector.load %arg1[%c1, %c0_15, %c0_16] : memref<28x8x16xf32, #tpu.memory_space<vmem>>, vector<1x8x16xf32>
    %15 = vector.shape_cast %14 : vector<1x8x16xf32> to vector<8x16xf32>
    %c2 = arith.constant 2 : index
    %c0_17 = arith.constant 0 : index
    %c0_18 = arith.constant 0 : index
    %16 = vector.load %arg1[%c2, %c0_17, %c0_18] : memref<28x8x16xf32, #tpu.memory_space<vmem>>, vector<1x8x16xf32>
    %17 = vector.shape_cast %16 : vector<1x8x16xf32> to vector<8x16xf32>
    %c3 = arith.constant 3 : index
    %c0_19 = arith.constant 0 : index
    %c0_20 = arith.constant 0 : index
    %18 = vector.load %arg1[%c3, %c0_19, %c0_20] : memref<28x8x16xf32, #tpu.memory_space<vmem>>, vector<1x8x16xf32>
    %19 = vector.shape_cast %18 : vector<1x8x16xf32> to vector<8x16xf32>
    %20 = arith.truncf %8 : vector<8x16xf32> to vector<8x16xbf16>
    %cst = arith.constant dense<0.000000e+00> : vector<8x32xf32>
    %21 = tpu.matmul %20, %0, %cst {dimension_numbers = #tpu.dot_dimension_numbers<[1], [0], [0], [1], [0, 0, 1, 1], [], []>} : vector<8x16xbf16>, vector<16x32xbf16>, vector<8x32xf32> -> vector<8x32xf32>
    %22 = arith.addf %21, %4 : vector<8x32xf32>
    %23 = math.tanh %22 : vector<8x32xf32>
    %24 = arith.truncf %23 : vector<8x32xf32> to vector<8x32xbf16>
    %cst_21 = arith.constant dense<0.000000e+00> : vector<8x16xf32>
    %25 = tpu.matmul %24, %1, %cst_21 {dimension_numbers = #tpu.dot_dimension_numbers<[1], [0], [0], [1], [0, 0, 1, 1], [], []>} : vector<8x32xbf16>, vector<32x16xbf16>, vector<8x16xf32> -> vector<8x16xf32>
    %26 = arith.addf %25, %7 : vector<8x16xf32>
    %27 = arith.mulf %17, %26 : vector<8x16xf32>
    %28 = arith.addf %8, %27 : vector<8x16xf32>
    %29 = arith.mulf %13, %26 : vector<8x16xf32>
    %30 = arith.addf %8, %29 : vector<8x16xf32>
    %31 = arith.truncf %30 : vector<8x16xf32> to vector<8x16xbf16>
    %cst_22 = arith.constant dense<0.000000e+00> : vector<8x32xf32>
    %32 = tpu.matmul %31, %0, %cst_22 {dimension_numbers = #tpu.dot_dimension_numbers<[1], [0], [0], [1], [0, 0, 1, 1], [], []>} : vector<8x16xbf16>, vector<16x32xbf16>, vector<8x32xf32> -> vector<8x32xf32>
    %33 = arith.addf %32, %4 : vector<8x32xf32>
    %34 = math.tanh %33 : vector<8x32xf32>
    %35 = arith.truncf %34 : vector<8x32xf32> to vector<8x32xbf16>
    %cst_23 = arith.constant dense<0.000000e+00> : vector<8x16xf32>
    %36 = tpu.matmul %35, %1, %cst_23 {dimension_numbers = #tpu.dot_dimension_numbers<[1], [0], [0], [1], [0, 0, 1, 1], [], []>} : vector<8x32xbf16>, vector<32x16xbf16>, vector<8x16xf32> -> vector<8x16xf32>
    %37 = arith.addf %36, %7 : vector<8x16xf32>
    %38 = arith.mulf %19, %37 : vector<8x16xf32>
    %39 = arith.addf %28, %38 : vector<8x16xf32>
    %40 = arith.mulf %13, %37 : vector<8x16xf32>
    %41 = arith.addf %8, %40 : vector<8x16xf32>
    %42 = arith.truncf %41 : vector<8x16xf32> to vector<8x16xbf16>
    %cst_24 = arith.constant dense<0.000000e+00> : vector<8x32xf32>
    %43 = tpu.matmul %42, %0, %cst_24 {dimension_numbers = #tpu.dot_dimension_numbers<[1], [0], [0], [1], [0, 0, 1, 1], [], []>} : vector<8x16xbf16>, vector<16x32xbf16>, vector<8x32xf32> -> vector<8x32xf32>
    %44 = arith.addf %43, %4 : vector<8x32xf32>
    %45 = math.tanh %44 : vector<8x32xf32>
    %46 = arith.truncf %45 : vector<8x32xf32> to vector<8x32xbf16>
    %cst_25 = arith.constant dense<0.000000e+00> : vector<8x16xf32>
    %47 = tpu.matmul %46, %1, %cst_25 {dimension_numbers = #tpu.dot_dimension_numbers<[1], [0], [0], [1], [0, 0, 1, 1], [], []>} : vector<8x32xbf16>, vector<32x16xbf16>, vector<8x16xf32> -> vector<8x16xf32>
    %48 = arith.addf %47, %7 : vector<8x16xf32>
    %49 = arith.mulf %19, %48 : vector<8x16xf32>
    %50 = arith.addf %39, %49 : vector<8x16xf32>
    %51 = arith.mulf %15, %48 : vector<8x16xf32>
    %52 = arith.addf %8, %51 : vector<8x16xf32>
    %53 = arith.truncf %52 : vector<8x16xf32> to vector<8x16xbf16>
    %cst_26 = arith.constant dense<0.000000e+00> : vector<8x32xf32>
    %54 = tpu.matmul %53, %0, %cst_26 {dimension_numbers = #tpu.dot_dimension_numbers<[1], [0], [0], [1], [0, 0, 1, 1], [], []>} : vector<8x16xbf16>, vector<16x32xbf16>, vector<8x32xf32> -> vector<8x32xf32>
    %55 = arith.addf %54, %4 : vector<8x32xf32>
    %56 = math.tanh %55 : vector<8x32xf32>
    %57 = arith.truncf %56 : vector<8x32xf32> to vector<8x32xbf16>
    %cst_27 = arith.constant dense<0.000000e+00> : vector<8x16xf32>
    %58 = tpu.matmul %57, %1, %cst_27 {dimension_numbers = #tpu.dot_dimension_numbers<[1], [0], [0], [1], [0, 0, 1, 1], [], []>} : vector<8x32xbf16>, vector<32x16xbf16>, vector<8x16xf32> -> vector<8x16xf32>
    %59 = arith.addf %58, %7 : vector<8x16xf32>
    %60 = arith.mulf %17, %59 : vector<8x16xf32>
    %61 = arith.addf %50, %60 : vector<8x16xf32>
    %c0_28 = arith.constant 0 : index
    %c1_29 = arith.constant 1 : index
    %c0_30 = arith.constant 0 : index
    %62 = vector.load %arg7[%c0_28, %c1_29, %c0_30] : memref<8x8x16xf32, #tpu.memory_space<vmem>>, vector<8x1x16xf32>
    %63 = vector.shape_cast %62 : vector<8x1x16xf32> to vector<8x16xf32>
    %64 = vector.shape_cast %61 : vector<8x16xf32> to vector<8x1x16xf32>
    tpu.vector_store %arg7[%c0_28, %c1_29, %c0_30], %64 {strides = array<i32>} : memref<8x8x16xf32, #tpu.memory_space<vmem>>, vector<8x1x16xf32>,
    %c4 = arith.constant 4 : index
    %c0_31 = arith.constant 0 : index
    %c0_32 = arith.constant 0 : index
    %65 = vector.load %arg1[%c4, %c0_31, %c0_32] : memref<28x8x16xf32, #tpu.memory_space<vmem>>, vector<1x8x16xf32>
    %66 = vector.shape_cast %65 : vector<1x8x16xf32> to vector<8x16xf32>
    %c5 = arith.constant 5 : index
    %c0_33 = arith.constant 0 : index
    %c0_34 = arith.constant 0 : index
    %67 = vector.load %arg1[%c5, %c0_33, %c0_34] : memref<28x8x16xf32, #tpu.memory_space<vmem>>, vector<1x8x16xf32>
    %68 = vector.shape_cast %67 : vector<1x8x16xf32> to vector<8x16xf32>
    %c6 = arith.constant 6 : index
    %c0_35 = arith.constant 0 : index
    %c0_36 = arith.constant 0 : index
    %69 = vector.load %arg1[%c6, %c0_35, %c0_36] : memref<28x8x16xf32, #tpu.memory_space<vmem>>, vector<1x8x16xf32>
    %70 = vector.shape_cast %69 : vector<1x8x16xf32> to vector<8x16xf32>
    %c7 = arith.constant 7 : index
    %c0_37 = arith.constant 0 : index
    %c0_38 = arith.constant 0 : index
    %71 = vector.load %arg1[%c7, %c0_37, %c0_38] : memref<28x8x16xf32, #tpu.memory_space<vmem>>, vector<1x8x16xf32>
    %72 = vector.shape_cast %71 : vector<1x8x16xf32> to vector<8x16xf32>
    %73 = arith.truncf %61 : vector<8x16xf32> to vector<8x16xbf16>
    %cst_39 = arith.constant dense<0.000000e+00> : vector<8x32xf32>
    %74 = tpu.matmul %73, %0, %cst_39 {dimension_numbers = #tpu.dot_dimension_numbers<[1], [0], [0], [1], [0, 0, 1, 1], [], []>} : vector<8x16xbf16>, vector<16x32xbf16>, vector<8x32xf32> -> vector<8x32xf32>
    %75 = arith.addf %74, %4 : vector<8x32xf32>
    %76 = math.tanh %75 : vector<8x32xf32>
    %77 = arith.truncf %76 : vector<8x32xf32> to vector<8x32xbf16>
    %cst_40 = arith.constant dense<0.000000e+00> : vector<8x16xf32>
    %78 = tpu.matmul %77, %1, %cst_40 {dimension_numbers = #tpu.dot_dimension_numbers<[1], [0], [0], [1], [0, 0, 1, 1], [], []>} : vector<8x32xbf16>, vector<32x16xbf16>, vector<8x16xf32> -> vector<8x16xf32>
    %79 = arith.addf %78, %7 : vector<8x16xf32>
    %80 = arith.mulf %70, %79 : vector<8x16xf32>
    %81 = arith.addf %61, %80 : vector<8x16xf32>
    %82 = arith.mulf %66, %79 : vector<8x16xf32>
    %83 = arith.addf %61, %82 : vector<8x16xf32>
    %84 = arith.truncf %83 : vector<8x16xf32> to vector<8x16xbf16>
    %cst_41 = arith.constant dense<0.000000e+00> : vector<8x32xf32>
    %85 = tpu.matmul %84, %0, %cst_41 {dimension_numbers = #tpu.dot_dimension_numbers<[1], [0], [0], [1], [0, 0, 1, 1], [], []>} : vector<8x16xbf16>, vector<16x32xbf16>, vector<8x32xf32> -> vector<8x32xf32>
    %86 = arith.addf %85, %4 : vector<8x32xf32>
    %87 = math.tanh %86 : vector<8x32xf32>
    %88 = arith.truncf %87 : vector<8x32xf32> to vector<8x32xbf16>
    %cst_42 = arith.constant dense<0.000000e+00> : vector<8x16xf32>
    %89 = tpu.matmul %88, %1, %cst_42 {dimension_numbers = #tpu.dot_dimension_numbers<[1], [0], [0], [1], [0, 0, 1, 1], [], []>} : vector<8x32xbf16>, vector<32x16xbf16>, vector<8x16xf32> -> vector<8x16xf32>
    %90 = arith.addf %89, %7 : vector<8x16xf32>
    %91 = arith.mulf %72, %90 : vector<8x16xf32>
    %92 = arith.addf %81, %91 : vector<8x16xf32>
    %93 = arith.mulf %66, %90 : vector<8x16xf32>
    %94 = arith.addf %61, %93 : vector<8x16xf32>
    %95 = arith.truncf %94 : vector<8x16xf32> to vector<8x16xbf16>
    %cst_43 = arith.constant dense<0.000000e+00> : vector<8x32xf32>
    %96 = tpu.matmul %95, %0, %cst_43 {dimension_numbers = #tpu.dot_dimension_numbers<[1], [0], [0], [1], [0, 0, 1, 1], [], []>} : vector<8x16xbf16>, vector<16x32xbf16>, vector<8x32xf32> -> vector<8x32xf32>
    %97 = arith.addf %96, %4 : vector<8x32xf32>
    %98 = math.tanh %97 : vector<8x32xf32>
    %99 = arith.truncf %98 : vector<8x32xf32> to vector<8x32xbf16>
    %cst_44 = arith.constant dense<0.000000e+00> : vector<8x16xf32>
    %100 = tpu.matmul %99, %1, %cst_44 {dimension_numbers = #tpu.dot_dimension_numbers<[1], [0], [0], [1], [0, 0, 1, 1], [], []>} : vector<8x32xbf16>, vector<32x16xbf16>, vector<8x16xf32> -> vector<8x16xf32>
    %101 = arith.addf %100, %7 : vector<8x16xf32>
    %102 = arith.mulf %72, %101 : vector<8x16xf32>
    %103 = arith.addf %92, %102 : vector<8x16xf32>
    %104 = arith.mulf %68, %101 : vector<8x16xf32>
    %105 = arith.addf %61, %104 : vector<8x16xf32>
    %106 = arith.truncf %105 : vector<8x16xf32> to vector<8x16xbf16>
    %cst_45 = arith.constant dense<0.000000e+00> : vector<8x32xf32>
    %107 = tpu.matmul %106, %0, %cst_45 {dimension_numbers = #tpu.dot_dimension_numbers<[1], [0], [0], [1], [0, 0, 1, 1], [], []>} : vector<8x16xbf16>, vector<16x32xbf16>, vector<8x32xf32> -> vector<8x32xf32>
    %108 = arith.addf %107, %4 : vector<8x32xf32>
    %109 = math.tanh %108 : vector<8x32xf32>
    %110 = arith.truncf %109 : vector<8x32xf32> to vector<8x32xbf16>
    %cst_46 = arith.constant dense<0.000000e+00> : vector<8x16xf32>
    %111 = tpu.matmul %110, %1, %cst_46 {dimension_numbers = #tpu.dot_dimension_numbers<[1], [0], [0], [1], [0, 0, 1, 1], [], []>} : vector<8x32xbf16>, vector<32x16xbf16>, vector<8x16xf32> -> vector<8x16xf32>
    %112 = arith.addf %111, %7 : vector<8x16xf32>
    %113 = arith.mulf %70, %112 : vector<8x16xf32>
    %114 = arith.addf %103, %113 : vector<8x16xf32>
    %c0_47 = arith.constant 0 : index
    %c2_48 = arith.constant 2 : index
    %c0_49 = arith.constant 0 : index
    %115 = vector.load %arg7[%c0_47, %c2_48, %c0_49] : memref<8x8x16xf32, #tpu.memory_space<vmem>>, vector<8x1x16xf32>
    %116 = vector.shape_cast %115 : vector<8x1x16xf32> to vector<8x16xf32>
    %117 = vector.shape_cast %114 : vector<8x16xf32> to vector<8x1x16xf32>
    tpu.vector_store %arg7[%c0_47, %c2_48, %c0_49], %117 {strides = array<i32>} : memref<8x8x16xf32, #tpu.memory_space<vmem>>, vector<8x1x16xf32>,
    %c8 = arith.constant 8 : index
    %c0_50 = arith.constant 0 : index
    %c0_51 = arith.constant 0 : index
    %118 = vector.load %arg1[%c8, %c0_50, %c0_51] : memref<28x8x16xf32, #tpu.memory_space<vmem>>, vector<1x8x16xf32>
    %119 = vector.shape_cast %118 : vector<1x8x16xf32> to vector<8x16xf32>
    %c9 = arith.constant 9 : index
    %c0_52 = arith.constant 0 : index
    %c0_53 = arith.constant 0 : index
    %120 = vector.load %arg1[%c9, %c0_52, %c0_53] : memref<28x8x16xf32, #tpu.memory_space<vmem>>, vector<1x8x16xf32>
    %121 = vector.shape_cast %120 : vector<1x8x16xf32> to vector<8x16xf32>
    %c10 = arith.constant 10 : index
    %c0_54 = arith.constant 0 : index
    %c0_55 = arith.constant 0 : index
    %122 = vector.load %arg1[%c10, %c0_54, %c0_55] : memref<28x8x16xf32, #tpu.memory_space<vmem>>, vector<1x8x16xf32>
    %123 = vector.shape_cast %122 : vector<1x8x16xf32> to vector<8x16xf32>
    %c11 = arith.constant 11 : index
    %c0_56 = arith.constant 0 : index
    %c0_57 = arith.constant 0 : index
    %124 = vector.load %arg1[%c11, %c0_56, %c0_57] : memref<28x8x16xf32, #tpu.memory_space<vmem>>, vector<1x8x16xf32>
    %125 = vector.shape_cast %124 : vector<1x8x16xf32> to vector<8x16xf32>
    %126 = arith.truncf %114 : vector<8x16xf32> to vector<8x16xbf16>
    %cst_58 = arith.constant dense<0.000000e+00> : vector<8x32xf32>
    %127 = tpu.matmul %126, %0, %cst_58 {dimension_numbers = #tpu.dot_dimension_numbers<[1], [0], [0], [1], [0, 0, 1, 1], [], []>} : vector<8x16xbf16>, vector<16x32xbf16>, vector<8x32xf32> -> vector<8x32xf32>
    %128 = arith.addf %127, %4 : vector<8x32xf32>
    %129 = math.tanh %128 : vector<8x32xf32>
    %130 = arith.truncf %129 : vector<8x32xf32> to vector<8x32xbf16>
    %cst_59 = arith.constant dense<0.000000e+00> : vector<8x16xf32>
    %131 = tpu.matmul %130, %1, %cst_59 {dimension_numbers = #tpu.dot_dimension_numbers<[1], [0], [0], [1], [0, 0, 1, 1], [], []>} : vector<8x32xbf16>, vector<32x16xbf16>, vector<8x16xf32> -> vector<8x16xf32>
    %132 = arith.addf %131, %7 : vector<8x16xf32>
    %133 = arith.mulf %123, %132 : vector<8x16xf32>
    %134 = arith.addf %114, %133 : vector<8x16xf32>
    %135 = arith.mulf %119, %132 : vector<8x16xf32>
    %136 = arith.addf %114, %135 : vector<8x16xf32>
    %137 = arith.truncf %136 : vector<8x16xf32> to vector<8x16xbf16>
    %cst_60 = arith.constant dense<0.000000e+00> : vector<8x32xf32>
    %138 = tpu.matmul %137, %0, %cst_60 {dimension_numbers = #tpu.dot_dimension_numbers<[1], [0], [0], [1], [0, 0, 1, 1], [], []>} : vector<8x16xbf16>, vector<16x32xbf16>, vector<8x32xf32> -> vector<8x32xf32>
    %139 = arith.addf %138, %4 : vector<8x32xf32>
    %140 = math.tanh %139 : vector<8x32xf32>
    %141 = arith.truncf %140 : vector<8x32xf32> to vector<8x32xbf16>
    %cst_61 = arith.constant dense<0.000000e+00> : vector<8x16xf32>
    %142 = tpu.matmul %141, %1, %cst_61 {dimension_numbers = #tpu.dot_dimension_numbers<[1], [0], [0], [1], [0, 0, 1, 1], [], []>} : vector<8x32xbf16>, vector<32x16xbf16>, vector<8x16xf32> -> vector<8x16xf32>
    %143 = arith.addf %142, %7 : vector<8x16xf32>
    %144 = arith.mulf %125, %143 : vector<8x16xf32>
    %145 = arith.addf %134, %144 : vector<8x16xf32>
    %146 = arith.mulf %119, %143 : vector<8x16xf32>
    %147 = arith.addf %114, %146 : vector<8x16xf32>
    %148 = arith.truncf %147 : vector<8x16xf32> to vector<8x16xbf16>
    %cst_62 = arith.constant dense<0.000000e+00> : vector<8x32xf32>
    %149 = tpu.matmul %148, %0, %cst_62 {dimension_numbers = #tpu.dot_dimension_numbers<[1], [0], [0], [1], [0, 0, 1, 1], [], []>} : vector<8x16xbf16>, vector<16x32xbf16>, vector<8x32xf32> -> vector<8x32xf32>
    %150 = arith.addf %149, %4 : vector<8x32xf32>
    %151 = math.tanh %150 : vector<8x32xf32>
    %152 = arith.truncf %151 : vector<8x32xf32> to vector<8x32xbf16>
    %cst_63 = arith.constant dense<0.000000e+00> : vector<8x16xf32>
    %153 = tpu.matmul %152, %1, %cst_63 {dimension_numbers = #tpu.dot_dimension_numbers<[1], [0], [0], [1], [0, 0, 1, 1], [], []>} : vector<8x32xbf16>, vector<32x16xbf16>, vector<8x16xf32> -> vector<8x16xf32>
    %154 = arith.addf %153, %7 : vector<8x16xf32>
    %155 = arith.mulf %125, %154 : vector<8x16xf32>
    %156 = arith.addf %145, %155 : vector<8x16xf32>
    %157 = arith.mulf %121, %154 : vector<8x16xf32>
    %158 = arith.addf %114, %157 : vector<8x16xf32>
    %159 = arith.truncf %158 : vector<8x16xf32> to vector<8x16xbf16>
    %cst_64 = arith.constant dense<0.000000e+00> : vector<8x32xf32>
    %160 = tpu.matmul %159, %0, %cst_64 {dimension_numbers = #tpu.dot_dimension_numbers<[1], [0], [0], [1], [0, 0, 1, 1], [], []>} : vector<8x16xbf16>, vector<16x32xbf16>, vector<8x32xf32> -> vector<8x32xf32>
    %161 = arith.addf %160, %4 : vector<8x32xf32>
    %162 = math.tanh %161 : vector<8x32xf32>
    %163 = arith.truncf %162 : vector<8x32xf32> to vector<8x32xbf16>
    %cst_65 = arith.constant dense<0.000000e+00> : vector<8x16xf32>
    %164 = tpu.matmul %163, %1, %cst_65 {dimension_numbers = #tpu.dot_dimension_numbers<[1], [0], [0], [1], [0, 0, 1, 1], [], []>} : vector<8x32xbf16>, vector<32x16xbf16>, vector<8x16xf32> -> vector<8x16xf32>
    %165 = arith.addf %164, %7 : vector<8x16xf32>
    %166 = arith.mulf %123, %165 : vector<8x16xf32>
    %167 = arith.addf %156, %166 : vector<8x16xf32>
    %c0_66 = arith.constant 0 : index
    %c3_67 = arith.constant 3 : index
    %c0_68 = arith.constant 0 : index
    %168 = vector.load %arg7[%c0_66, %c3_67, %c0_68] : memref<8x8x16xf32, #tpu.memory_space<vmem>>, vector<8x1x16xf32>
    %169 = vector.shape_cast %168 : vector<8x1x16xf32> to vector<8x16xf32>
    %170 = vector.shape_cast %167 : vector<8x16xf32> to vector<8x1x16xf32>
    tpu.vector_store %arg7[%c0_66, %c3_67, %c0_68], %170 {strides = array<i32>} : memref<8x8x16xf32, #tpu.memory_space<vmem>>, vector<8x1x16xf32>,
    %c12 = arith.constant 12 : index
    %c0_69 = arith.constant 0 : index
    %c0_70 = arith.constant 0 : index
    %171 = vector.load %arg1[%c12, %c0_69, %c0_70] : memref<28x8x16xf32, #tpu.memory_space<vmem>>, vector<1x8x16xf32>
    %172 = vector.shape_cast %171 : vector<1x8x16xf32> to vector<8x16xf32>
    %c13 = arith.constant 13 : index
    %c0_71 = arith.constant 0 : index
    %c0_72 = arith.constant 0 : index
    %173 = vector.load %arg1[%c13, %c0_71, %c0_72] : memref<28x8x16xf32, #tpu.memory_space<vmem>>, vector<1x8x16xf32>
    %174 = vector.shape_cast %173 : vector<1x8x16xf32> to vector<8x16xf32>
    %c14 = arith.constant 14 : index
    %c0_73 = arith.constant 0 : index
    %c0_74 = arith.constant 0 : index
    %175 = vector.load %arg1[%c14, %c0_73, %c0_74] : memref<28x8x16xf32, #tpu.memory_space<vmem>>, vector<1x8x16xf32>
    %176 = vector.shape_cast %175 : vector<1x8x16xf32> to vector<8x16xf32>
    %c15 = arith.constant 15 : index
    %c0_75 = arith.constant 0 : index
    %c0_76 = arith.constant 0 : index
    %177 = vector.load %arg1[%c15, %c0_75, %c0_76] : memref<28x8x16xf32, #tpu.memory_space<vmem>>, vector<1x8x16xf32>
    %178 = vector.shape_cast %177 : vector<1x8x16xf32> to vector<8x16xf32>
    %179 = arith.truncf %167 : vector<8x16xf32> to vector<8x16xbf16>
    %cst_77 = arith.constant dense<0.000000e+00> : vector<8x32xf32>
    %180 = tpu.matmul %179, %0, %cst_77 {dimension_numbers = #tpu.dot_dimension_numbers<[1], [0], [0], [1], [0, 0, 1, 1], [], []>} : vector<8x16xbf16>, vector<16x32xbf16>, vector<8x32xf32> -> vector<8x32xf32>
    %181 = arith.addf %180, %4 : vector<8x32xf32>
    %182 = math.tanh %181 : vector<8x32xf32>
    %183 = arith.truncf %182 : vector<8x32xf32> to vector<8x32xbf16>
    %cst_78 = arith.constant dense<0.000000e+00> : vector<8x16xf32>
    %184 = tpu.matmul %183, %1, %cst_78 {dimension_numbers = #tpu.dot_dimension_numbers<[1], [0], [0], [1], [0, 0, 1, 1], [], []>} : vector<8x32xbf16>, vector<32x16xbf16>, vector<8x16xf32> -> vector<8x16xf32>
    %185 = arith.addf %184, %7 : vector<8x16xf32>
    %186 = arith.mulf %176, %185 : vector<8x16xf32>
    %187 = arith.addf %167, %186 : vector<8x16xf32>
    %188 = arith.mulf %172, %185 : vector<8x16xf32>
    %189 = arith.addf %167, %188 : vector<8x16xf32>
    %190 = arith.truncf %189 : vector<8x16xf32> to vector<8x16xbf16>
    %cst_79 = arith.constant dense<0.000000e+00> : vector<8x32xf32>
    %191 = tpu.matmul %190, %0, %cst_79 {dimension_numbers = #tpu.dot_dimension_numbers<[1], [0], [0], [1], [0, 0, 1, 1], [], []>} : vector<8x16xbf16>, vector<16x32xbf16>, vector<8x32xf32> -> vector<8x32xf32>
    %192 = arith.addf %191, %4 : vector<8x32xf32>
    %193 = math.tanh %192 : vector<8x32xf32>
    %194 = arith.truncf %193 : vector<8x32xf32> to vector<8x32xbf16>
    %cst_80 = arith.constant dense<0.000000e+00> : vector<8x16xf32>
    %195 = tpu.matmul %194, %1, %cst_80 {dimension_numbers = #tpu.dot_dimension_numbers<[1], [0], [0], [1], [0, 0, 1, 1], [], []>} : vector<8x32xbf16>, vector<32x16xbf16>, vector<8x16xf32> -> vector<8x16xf32>
    %196 = arith.addf %195, %7 : vector<8x16xf32>
    %197 = arith.mulf %178, %196 : vector<8x16xf32>
    %198 = arith.addf %187, %197 : vector<8x16xf32>
    %199 = arith.mulf %172, %196 : vector<8x16xf32>
    %200 = arith.addf %167, %199 : vector<8x16xf32>
    %201 = arith.truncf %200 : vector<8x16xf32> to vector<8x16xbf16>
    %cst_81 = arith.constant dense<0.000000e+00> : vector<8x32xf32>
    %202 = tpu.matmul %201, %0, %cst_81 {dimension_numbers = #tpu.dot_dimension_numbers<[1], [0], [0], [1], [0, 0, 1, 1], [], []>} : vector<8x16xbf16>, vector<16x32xbf16>, vector<8x32xf32> -> vector<8x32xf32>
    %203 = arith.addf %202, %4 : vector<8x32xf32>
    %204 = math.tanh %203 : vector<8x32xf32>
    %205 = arith.truncf %204 : vector<8x32xf32> to vector<8x32xbf16>
    %cst_82 = arith.constant dense<0.000000e+00> : vector<8x16xf32>
    %206 = tpu.matmul %205, %1, %cst_82 {dimension_numbers = #tpu.dot_dimension_numbers<[1], [0], [0], [1], [0, 0, 1, 1], [], []>} : vector<8x32xbf16>, vector<32x16xbf16>, vector<8x16xf32> -> vector<8x16xf32>
    %207 = arith.addf %206, %7 : vector<8x16xf32>
    %208 = arith.mulf %178, %207 : vector<8x16xf32>
    %209 = arith.addf %198, %208 : vector<8x16xf32>
    %210 = arith.mulf %174, %207 : vector<8x16xf32>
    %211 = arith.addf %167, %210 : vector<8x16xf32>
    %212 = arith.truncf %211 : vector<8x16xf32> to vector<8x16xbf16>
    %cst_83 = arith.constant dense<0.000000e+00> : vector<8x32xf32>
    %213 = tpu.matmul %212, %0, %cst_83 {dimension_numbers = #tpu.dot_dimension_numbers<[1], [0], [0], [1], [0, 0, 1, 1], [], []>} : vector<8x16xbf16>, vector<16x32xbf16>, vector<8x32xf32> -> vector<8x32xf32>
    %214 = arith.addf %213, %4 : vector<8x32xf32>
    %215 = math.tanh %214 : vector<8x32xf32>
    %216 = arith.truncf %215 : vector<8x32xf32> to vector<8x32xbf16>
    %cst_84 = arith.constant dense<0.000000e+00> : vector<8x16xf32>
    %217 = tpu.matmul %216, %1, %cst_84 {dimension_numbers = #tpu.dot_dimension_numbers<[1], [0], [0], [1], [0, 0, 1, 1], [], []>} : vector<8x32xbf16>, vector<32x16xbf16>, vector<8x16xf32> -> vector<8x16xf32>
    %218 = arith.addf %217, %7 : vector<8x16xf32>
    %219 = arith.mulf %176, %218 : vector<8x16xf32>
    %220 = arith.addf %209, %219 : vector<8x16xf32>
    %c0_85 = arith.constant 0 : index
    %c4_86 = arith.constant 4 : index
    %c0_87 = arith.constant 0 : index
    %221 = vector.load %arg7[%c0_85, %c4_86, %c0_87] : memref<8x8x16xf32, #tpu.memory_space<vmem>>, vector<8x1x16xf32>
    %222 = vector.shape_cast %221 : vector<8x1x16xf32> to vector<8x16xf32>
    %223 = vector.shape_cast %220 : vector<8x16xf32> to vector<8x1x16xf32>
    tpu.vector_store %arg7[%c0_85, %c4_86, %c0_87], %223 {strides = array<i32>} : memref<8x8x16xf32, #tpu.memory_space<vmem>>, vector<8x1x16xf32>,
    %c16 = arith.constant 16 : index
    %c0_88 = arith.constant 0 : index
    %c0_89 = arith.constant 0 : index
    %224 = vector.load %arg1[%c16, %c0_88, %c0_89] : memref<28x8x16xf32, #tpu.memory_space<vmem>>, vector<1x8x16xf32>
    %225 = vector.shape_cast %224 : vector<1x8x16xf32> to vector<8x16xf32>
    %c17 = arith.constant 17 : index
    %c0_90 = arith.constant 0 : index
    %c0_91 = arith.constant 0 : index
    %226 = vector.load %arg1[%c17, %c0_90, %c0_91] : memref<28x8x16xf32, #tpu.memory_space<vmem>>, vector<1x8x16xf32>
    %227 = vector.shape_cast %226 : vector<1x8x16xf32> to vector<8x16xf32>
    %c18 = arith.constant 18 : index
    %c0_92 = arith.constant 0 : index
    %c0_93 = arith.constant 0 : index
    %228 = vector.load %arg1[%c18, %c0_92, %c0_93] : memref<28x8x16xf32, #tpu.memory_space<vmem>>, vector<1x8x16xf32>
    %229 = vector.shape_cast %228 : vector<1x8x16xf32> to vector<8x16xf32>
    %c19 = arith.constant 19 : index
    %c0_94 = arith.constant 0 : index
    %c0_95 = arith.constant 0 : index
    %230 = vector.load %arg1[%c19, %c0_94, %c0_95] : memref<28x8x16xf32, #tpu.memory_space<vmem>>, vector<1x8x16xf32>
    %231 = vector.shape_cast %230 : vector<1x8x16xf32> to vector<8x16xf32>
    %232 = arith.truncf %220 : vector<8x16xf32> to vector<8x16xbf16>
    %cst_96 = arith.constant dense<0.000000e+00> : vector<8x32xf32>
    %233 = tpu.matmul %232, %0, %cst_96 {dimension_numbers = #tpu.dot_dimension_numbers<[1], [0], [0], [1], [0, 0, 1, 1], [], []>} : vector<8x16xbf16>, vector<16x32xbf16>, vector<8x32xf32> -> vector<8x32xf32>
    %234 = arith.addf %233, %4 : vector<8x32xf32>
    %235 = math.tanh %234 : vector<8x32xf32>
    %236 = arith.truncf %235 : vector<8x32xf32> to vector<8x32xbf16>
    %cst_97 = arith.constant dense<0.000000e+00> : vector<8x16xf32>
    %237 = tpu.matmul %236, %1, %cst_97 {dimension_numbers = #tpu.dot_dimension_numbers<[1], [0], [0], [1], [0, 0, 1, 1], [], []>} : vector<8x32xbf16>, vector<32x16xbf16>, vector<8x16xf32> -> vector<8x16xf32>
    %238 = arith.addf %237, %7 : vector<8x16xf32>
    %239 = arith.mulf %229, %238 : vector<8x16xf32>
    %240 = arith.addf %220, %239 : vector<8x16xf32>
    %241 = arith.mulf %225, %238 : vector<8x16xf32>
    %242 = arith.addf %220, %241 : vector<8x16xf32>
    %243 = arith.truncf %242 : vector<8x16xf32> to vector<8x16xbf16>
    %cst_98 = arith.constant dense<0.000000e+00> : vector<8x32xf32>
    %244 = tpu.matmul %243, %0, %cst_98 {dimension_numbers = #tpu.dot_dimension_numbers<[1], [0], [0], [1], [0, 0, 1, 1], [], []>} : vector<8x16xbf16>, vector<16x32xbf16>, vector<8x32xf32> -> vector<8x32xf32>
    %245 = arith.addf %244, %4 : vector<8x32xf32>
    %246 = math.tanh %245 : vector<8x32xf32>
    %247 = arith.truncf %246 : vector<8x32xf32> to vector<8x32xbf16>
    %cst_99 = arith.constant dense<0.000000e+00> : vector<8x16xf32>
    %248 = tpu.matmul %247, %1, %cst_99 {dimension_numbers = #tpu.dot_dimension_numbers<[1], [0], [0], [1], [0, 0, 1, 1], [], []>} : vector<8x32xbf16>, vector<32x16xbf16>, vector<8x16xf32> -> vector<8x16xf32>
    %249 = arith.addf %248, %7 : vector<8x16xf32>
    %250 = arith.mulf %231, %249 : vector<8x16xf32>
    %251 = arith.addf %240, %250 : vector<8x16xf32>
    %252 = arith.mulf %225, %249 : vector<8x16xf32>
    %253 = arith.addf %220, %252 : vector<8x16xf32>
    %254 = arith.truncf %253 : vector<8x16xf32> to vector<8x16xbf16>
    %cst_100 = arith.constant dense<0.000000e+00> : vector<8x32xf32>
    %255 = tpu.matmul %254, %0, %cst_100 {dimension_numbers = #tpu.dot_dimension_numbers<[1], [0], [0], [1], [0, 0, 1, 1], [], []>} : vector<8x16xbf16>, vector<16x32xbf16>, vector<8x32xf32> -> vector<8x32xf32>
    %256 = arith.addf %255, %4 : vector<8x32xf32>
    %257 = math.tanh %256 : vector<8x32xf32>
    %258 = arith.truncf %257 : vector<8x32xf32> to vector<8x32xbf16>
    %cst_101 = arith.constant dense<0.000000e+00> : vector<8x16xf32>
    %259 = tpu.matmul %258, %1, %cst_101 {dimension_numbers = #tpu.dot_dimension_numbers<[1], [0], [0], [1], [0, 0, 1, 1], [], []>} : vector<8x32xbf16>, vector<32x16xbf16>, vector<8x16xf32> -> vector<8x16xf32>
    %260 = arith.addf %259, %7 : vector<8x16xf32>
    %261 = arith.mulf %231, %260 : vector<8x16xf32>
    %262 = arith.addf %251, %261 : vector<8x16xf32>
    %263 = arith.mulf %227, %260 : vector<8x16xf32>
    %264 = arith.addf %220, %263 : vector<8x16xf32>
    %265 = arith.truncf %264 : vector<8x16xf32> to vector<8x16xbf16>
    %cst_102 = arith.constant dense<0.000000e+00> : vector<8x32xf32>
    %266 = tpu.matmul %265, %0, %cst_102 {dimension_numbers = #tpu.dot_dimension_numbers<[1], [0], [0], [1], [0, 0, 1, 1], [], []>} : vector<8x16xbf16>, vector<16x32xbf16>, vector<8x32xf32> -> vector<8x32xf32>
    %267 = arith.addf %266, %4 : vector<8x32xf32>
    %268 = math.tanh %267 : vector<8x32xf32>
    %269 = arith.truncf %268 : vector<8x32xf32> to vector<8x32xbf16>
    %cst_103 = arith.constant dense<0.000000e+00> : vector<8x16xf32>
    %270 = tpu.matmul %269, %1, %cst_103 {dimension_numbers = #tpu.dot_dimension_numbers<[1], [0], [0], [1], [0, 0, 1, 1], [], []>} : vector<8x32xbf16>, vector<32x16xbf16>, vector<8x16xf32> -> vector<8x16xf32>
    %271 = arith.addf %270, %7 : vector<8x16xf32>
    %272 = arith.mulf %229, %271 : vector<8x16xf32>
    %273 = arith.addf %262, %272 : vector<8x16xf32>
    %c0_104 = arith.constant 0 : index
    %c5_105 = arith.constant 5 : index
    %c0_106 = arith.constant 0 : index
    %274 = vector.load %arg7[%c0_104, %c5_105, %c0_106] : memref<8x8x16xf32, #tpu.memory_space<vmem>>, vector<8x1x16xf32>
    %275 = vector.shape_cast %274 : vector<8x1x16xf32> to vector<8x16xf32>
    %276 = vector.shape_cast %273 : vector<8x16xf32> to vector<8x1x16xf32>
    tpu.vector_store %arg7[%c0_104, %c5_105, %c0_106], %276 {strides = array<i32>} : memref<8x8x16xf32, #tpu.memory_space<vmem>>, vector<8x1x16xf32>,
    %c20 = arith.constant 20 : index
    %c0_107 = arith.constant 0 : index
    %c0_108 = arith.constant 0 : index
    %277 = vector.load %arg1[%c20, %c0_107, %c0_108] : memref<28x8x16xf32, #tpu.memory_space<vmem>>, vector<1x8x16xf32>
    %278 = vector.shape_cast %277 : vector<1x8x16xf32> to vector<8x16xf32>
    %c21 = arith.constant 21 : index
    %c0_109 = arith.constant 0 : index
    %c0_110 = arith.constant 0 : index
    %279 = vector.load %arg1[%c21, %c0_109, %c0_110] : memref<28x8x16xf32, #tpu.memory_space<vmem>>, vector<1x8x16xf32>
    %280 = vector.shape_cast %279 : vector<1x8x16xf32> to vector<8x16xf32>
    %c22 = arith.constant 22 : index
    %c0_111 = arith.constant 0 : index
    %c0_112 = arith.constant 0 : index
    %281 = vector.load %arg1[%c22, %c0_111, %c0_112] : memref<28x8x16xf32, #tpu.memory_space<vmem>>, vector<1x8x16xf32>
    %282 = vector.shape_cast %281 : vector<1x8x16xf32> to vector<8x16xf32>
    %c23 = arith.constant 23 : index
    %c0_113 = arith.constant 0 : index
    %c0_114 = arith.constant 0 : index
    %283 = vector.load %arg1[%c23, %c0_113, %c0_114] : memref<28x8x16xf32, #tpu.memory_space<vmem>>, vector<1x8x16xf32>
    %284 = vector.shape_cast %283 : vector<1x8x16xf32> to vector<8x16xf32>
    %285 = arith.truncf %273 : vector<8x16xf32> to vector<8x16xbf16>
    %cst_115 = arith.constant dense<0.000000e+00> : vector<8x32xf32>
    %286 = tpu.matmul %285, %0, %cst_115 {dimension_numbers = #tpu.dot_dimension_numbers<[1], [0], [0], [1], [0, 0, 1, 1], [], []>} : vector<8x16xbf16>, vector<16x32xbf16>, vector<8x32xf32> -> vector<8x32xf32>
    %287 = arith.addf %286, %4 : vector<8x32xf32>
    %288 = math.tanh %287 : vector<8x32xf32>
    %289 = arith.truncf %288 : vector<8x32xf32> to vector<8x32xbf16>
    %cst_116 = arith.constant dense<0.000000e+00> : vector<8x16xf32>
    %290 = tpu.matmul %289, %1, %cst_116 {dimension_numbers = #tpu.dot_dimension_numbers<[1], [0], [0], [1], [0, 0, 1, 1], [], []>} : vector<8x32xbf16>, vector<32x16xbf16>, vector<8x16xf32> -> vector<8x16xf32>
    %291 = arith.addf %290, %7 : vector<8x16xf32>
    %292 = arith.mulf %282, %291 : vector<8x16xf32>
    %293 = arith.addf %273, %292 : vector<8x16xf32>
    %294 = arith.mulf %278, %291 : vector<8x16xf32>
    %295 = arith.addf %273, %294 : vector<8x16xf32>
    %296 = arith.truncf %295 : vector<8x16xf32> to vector<8x16xbf16>
    %cst_117 = arith.constant dense<0.000000e+00> : vector<8x32xf32>
    %297 = tpu.matmul %296, %0, %cst_117 {dimension_numbers = #tpu.dot_dimension_numbers<[1], [0], [0], [1], [0, 0, 1, 1], [], []>} : vector<8x16xbf16>, vector<16x32xbf16>, vector<8x32xf32> -> vector<8x32xf32>
    %298 = arith.addf %297, %4 : vector<8x32xf32>
    %299 = math.tanh %298 : vector<8x32xf32>
    %300 = arith.truncf %299 : vector<8x32xf32> to vector<8x32xbf16>
    %cst_118 = arith.constant dense<0.000000e+00> : vector<8x16xf32>
    %301 = tpu.matmul %300, %1, %cst_118 {dimension_numbers = #tpu.dot_dimension_numbers<[1], [0], [0], [1], [0, 0, 1, 1], [], []>} : vector<8x32xbf16>, vector<32x16xbf16>, vector<8x16xf32> -> vector<8x16xf32>
    %302 = arith.addf %301, %7 : vector<8x16xf32>
    %303 = arith.mulf %284, %302 : vector<8x16xf32>
    %304 = arith.addf %293, %303 : vector<8x16xf32>
    %305 = arith.mulf %278, %302 : vector<8x16xf32>
    %306 = arith.addf %273, %305 : vector<8x16xf32>
    %307 = arith.truncf %306 : vector<8x16xf32> to vector<8x16xbf16>
    %cst_119 = arith.constant dense<0.000000e+00> : vector<8x32xf32>
    %308 = tpu.matmul %307, %0, %cst_119 {dimension_numbers = #tpu.dot_dimension_numbers<[1], [0], [0], [1], [0, 0, 1, 1], [], []>} : vector<8x16xbf16>, vector<16x32xbf16>, vector<8x32xf32> -> vector<8x32xf32>
    %309 = arith.addf %308, %4 : vector<8x32xf32>
    %310 = math.tanh %309 : vector<8x32xf32>
    %311 = arith.truncf %310 : vector<8x32xf32> to vector<8x32xbf16>
    %cst_120 = arith.constant dense<0.000000e+00> : vector<8x16xf32>
    %312 = tpu.matmul %311, %1, %cst_120 {dimension_numbers = #tpu.dot_dimension_numbers<[1], [0], [0], [1], [0, 0, 1, 1], [], []>} : vector<8x32xbf16>, vector<32x16xbf16>, vector<8x16xf32> -> vector<8x16xf32>
    %313 = arith.addf %312, %7 : vector<8x16xf32>
    %314 = arith.mulf %284, %313 : vector<8x16xf32>
    %315 = arith.addf %304, %314 : vector<8x16xf32>
    %316 = arith.mulf %280, %313 : vector<8x16xf32>
    %317 = arith.addf %273, %316 : vector<8x16xf32>
    %318 = arith.truncf %317 : vector<8x16xf32> to vector<8x16xbf16>
    %cst_121 = arith.constant dense<0.000000e+00> : vector<8x32xf32>
    %319 = tpu.matmul %318, %0, %cst_121 {dimension_numbers = #tpu.dot_dimension_numbers<[1], [0], [0], [1], [0, 0, 1, 1], [], []>} : vector<8x16xbf16>, vector<16x32xbf16>, vector<8x32xf32> -> vector<8x32xf32>
    %320 = arith.addf %319, %4 : vector<8x32xf32>
    %321 = math.tanh %320 : vector<8x32xf32>
    %322 = arith.truncf %321 : vector<8x32xf32> to vector<8x32xbf16>
    %cst_122 = arith.constant dense<0.000000e+00> : vector<8x16xf32>
    %323 = tpu.matmul %322, %1, %cst_122 {dimension_numbers = #tpu.dot_dimension_numbers<[1], [0], [0], [1], [0, 0, 1, 1], [], []>} : vector<8x32xbf16>, vector<32x16xbf16>, vector<8x16xf32> -> vector<8x16xf32>
    %324 = arith.addf %323, %7 : vector<8x16xf32>
    %325 = arith.mulf %282, %324 : vector<8x16xf32>
    %326 = arith.addf %315, %325 : vector<8x16xf32>
    %c0_123 = arith.constant 0 : index
    %c6_124 = arith.constant 6 : index
    %c0_125 = arith.constant 0 : index
    %327 = vector.load %arg7[%c0_123, %c6_124, %c0_125] : memref<8x8x16xf32, #tpu.memory_space<vmem>>, vector<8x1x16xf32>
    %328 = vector.shape_cast %327 : vector<8x1x16xf32> to vector<8x16xf32>
    %329 = vector.shape_cast %326 : vector<8x16xf32> to vector<8x1x16xf32>
    tpu.vector_store %arg7[%c0_123, %c6_124, %c0_125], %329 {strides = array<i32>} : memref<8x8x16xf32, #tpu.memory_space<vmem>>, vector<8x1x16xf32>,
    %c24 = arith.constant 24 : index
    %c0_126 = arith.constant 0 : index
    %c0_127 = arith.constant 0 : index
    %330 = vector.load %arg1[%c24, %c0_126, %c0_127] : memref<28x8x16xf32, #tpu.memory_space<vmem>>, vector<1x8x16xf32>
    %331 = vector.shape_cast %330 : vector<1x8x16xf32> to vector<8x16xf32>
    %c25 = arith.constant 25 : index
    %c0_128 = arith.constant 0 : index
    %c0_129 = arith.constant 0 : index
    %332 = vector.load %arg1[%c25, %c0_128, %c0_129] : memref<28x8x16xf32, #tpu.memory_space<vmem>>, vector<1x8x16xf32>
    %333 = vector.shape_cast %332 : vector<1x8x16xf32> to vector<8x16xf32>
    %c26 = arith.constant 26 : index
    %c0_130 = arith.constant 0 : index
    %c0_131 = arith.constant 0 : index
    %334 = vector.load %arg1[%c26, %c0_130, %c0_131] : memref<28x8x16xf32, #tpu.memory_space<vmem>>, vector<1x8x16xf32>
    %335 = vector.shape_cast %334 : vector<1x8x16xf32> to vector<8x16xf32>
    %c27 = arith.constant 27 : index
    %c0_132 = arith.constant 0 : index
    %c0_133 = arith.constant 0 : index
    %336 = vector.load %arg1[%c27, %c0_132, %c0_133] : memref<28x8x16xf32, #tpu.memory_space<vmem>>, vector<1x8x16xf32>
    %337 = vector.shape_cast %336 : vector<1x8x16xf32> to vector<8x16xf32>
    %338 = arith.truncf %326 : vector<8x16xf32> to vector<8x16xbf16>
    %cst_134 = arith.constant dense<0.000000e+00> : vector<8x32xf32>
    %339 = tpu.matmul %338, %0, %cst_134 {dimension_numbers = #tpu.dot_dimension_numbers<[1], [0], [0], [1], [0, 0, 1, 1], [], []>} : vector<8x16xbf16>, vector<16x32xbf16>, vector<8x32xf32> -> vector<8x32xf32>
    %340 = arith.addf %339, %4 : vector<8x32xf32>
    %341 = math.tanh %340 : vector<8x32xf32>
    %342 = arith.truncf %341 : vector<8x32xf32> to vector<8x32xbf16>
    %cst_135 = arith.constant dense<0.000000e+00> : vector<8x16xf32>
    %343 = tpu.matmul %342, %1, %cst_135 {dimension_numbers = #tpu.dot_dimension_numbers<[1], [0], [0], [1], [0, 0, 1, 1], [], []>} : vector<8x32xbf16>, vector<32x16xbf16>, vector<8x16xf32> -> vector<8x16xf32>
    %344 = arith.addf %343, %7 : vector<8x16xf32>
    %345 = arith.mulf %335, %344 : vector<8x16xf32>
    %346 = arith.addf %326, %345 : vector<8x16xf32>
    %347 = arith.mulf %331, %344 : vector<8x16xf32>
    %348 = arith.addf %326, %347 : vector<8x16xf32>
    %349 = arith.truncf %348 : vector<8x16xf32> to vector<8x16xbf16>
    %cst_136 = arith.constant dense<0.000000e+00> : vector<8x32xf32>
    %350 = tpu.matmul %349, %0, %cst_136 {dimension_numbers = #tpu.dot_dimension_numbers<[1], [0], [0], [1], [0, 0, 1, 1], [], []>} : vector<8x16xbf16>, vector<16x32xbf16>, vector<8x32xf32> -> vector<8x32xf32>
    %351 = arith.addf %350, %4 : vector<8x32xf32>
    %352 = math.tanh %351 : vector<8x32xf32>
    %353 = arith.truncf %352 : vector<8x32xf32> to vector<8x32xbf16>
    %cst_137 = arith.constant dense<0.000000e+00> : vector<8x16xf32>
    %354 = tpu.matmul %353, %1, %cst_137 {dimension_numbers = #tpu.dot_dimension_numbers<[1], [0], [0], [1], [0, 0, 1, 1], [], []>} : vector<8x32xbf16>, vector<32x16xbf16>, vector<8x16xf32> -> vector<8x16xf32>
    %355 = arith.addf %354, %7 : vector<8x16xf32>
    %356 = arith.mulf %337, %355 : vector<8x16xf32>
    %357 = arith.addf %346, %356 : vector<8x16xf32>
    %358 = arith.mulf %331, %355 : vector<8x16xf32>
    %359 = arith.addf %326, %358 : vector<8x16xf32>
    %360 = arith.truncf %359 : vector<8x16xf32> to vector<8x16xbf16>
    %cst_138 = arith.constant dense<0.000000e+00> : vector<8x32xf32>
    %361 = tpu.matmul %360, %0, %cst_138 {dimension_numbers = #tpu.dot_dimension_numbers<[1], [0], [0], [1], [0, 0, 1, 1], [], []>} : vector<8x16xbf16>, vector<16x32xbf16>, vector<8x32xf32> -> vector<8x32xf32>
    %362 = arith.addf %361, %4 : vector<8x32xf32>
    %363 = math.tanh %362 : vector<8x32xf32>
    %364 = arith.truncf %363 : vector<8x32xf32> to vector<8x32xbf16>
    %cst_139 = arith.constant dense<0.000000e+00> : vector<8x16xf32>
    %365 = tpu.matmul %364, %1, %cst_139 {dimension_numbers = #tpu.dot_dimension_numbers<[1], [0], [0], [1], [0, 0, 1, 1], [], []>} : vector<8x32xbf16>, vector<32x16xbf16>, vector<8x16xf32> -> vector<8x16xf32>
    %366 = arith.addf %365, %7 : vector<8x16xf32>
    %367 = arith.mulf %337, %366 : vector<8x16xf32>
    %368 = arith.addf %357, %367 : vector<8x16xf32>
    %369 = arith.mulf %333, %366 : vector<8x16xf32>
    %370 = arith.addf %326, %369 : vector<8x16xf32>
    %371 = arith.truncf %370 : vector<8x16xf32> to vector<8x16xbf16>
    %cst_140 = arith.constant dense<0.000000e+00> : vector<8x32xf32>
    %372 = tpu.matmul %371, %0, %cst_140 {dimension_numbers = #tpu.dot_dimension_numbers<[1], [0], [0], [1], [0, 0, 1, 1], [], []>} : vector<8x16xbf16>, vector<16x32xbf16>, vector<8x32xf32> -> vector<8x32xf32>
    %373 = arith.addf %372, %4 : vector<8x32xf32>
    %374 = math.tanh %373 : vector<8x32xf32>
    %375 = arith.truncf %374 : vector<8x32xf32> to vector<8x32xbf16>
    %cst_141 = arith.constant dense<0.000000e+00> : vector<8x16xf32>
    %376 = tpu.matmul %375, %1, %cst_141 {dimension_numbers = #tpu.dot_dimension_numbers<[1], [0], [0], [1], [0, 0, 1, 1], [], []>} : vector<8x32xbf16>, vector<32x16xbf16>, vector<8x16xf32> -> vector<8x16xf32>
    %377 = arith.addf %376, %7 : vector<8x16xf32>
    %378 = arith.mulf %335, %377 : vector<8x16xf32>
    %379 = arith.addf %368, %378 : vector<8x16xf32>
    %c0_142 = arith.constant 0 : index
    %c7_143 = arith.constant 7 : index
    %c0_144 = arith.constant 0 : index
    %380 = vector.load %arg7[%c0_142, %c7_143, %c0_144] : memref<8x8x16xf32, #tpu.memory_space<vmem>>, vector<8x1x16xf32>
    %381 = vector.shape_cast %380 : vector<8x1x16xf32> to vector<8x16xf32>
    %382 = vector.shape_cast %379 : vector<8x16xf32> to vector<8x1x16xf32>
    tpu.vector_store %arg7[%c0_142, %c7_143, %c0_144], %382 {strides = array<i32>} : memref<8x8x16xf32, #tpu.memory_space<vmem>>, vector<8x1x16xf32>,
    return
  }
  func.func @transform_0(%arg0: i32) -> (i32, i32, i32) {
    %c0_i32 = arith.constant 0 : i32
    %c0_i32_0 = arith.constant 0 : i32
    %c0_i32_1 = arith.constant 0 : i32
    return %c0_i32, %arg0, %c0_i32_0 : i32, i32, i32
  }
  func.func @transform_1(%arg0: i32) -> (i32, i32) {
    %c0_i32 = arith.constant 0 : i32
    %c0_i32_0 = arith.constant 0 : i32
    return %arg0, %c0_i32 : i32, i32
  }
  func.func @transform_2(%arg0: i32) -> (i32, i32) {
    %c0_i32 = arith.constant 0 : i32
    %c0_i32_0 = arith.constant 0 : i32
    %c0_i32_1 = arith.constant 0 : i32
    return %c0_i32, %c0_i32_0 : i32, i32
  }
  func.func @transform_3(%arg0: i32) -> (i32, i32) {
    %c0_i32 = arith.constant 0 : i32
    %c0_i32_0 = arith.constant 0 : i32
    %c0_i32_1 = arith.constant 0 : i32
    return %c0_i32, %c0_i32_0 : i32, i32
  }
  func.func @transform_4(%arg0: i32) -> (i32, i32) {
    %c0_i32 = arith.constant 0 : i32
    %c0_i32_0 = arith.constant 0 : i32
    %c0_i32_1 = arith.constant 0 : i32
    return %c0_i32, %c0_i32_0 : i32, i32
  }
  func.func @transform_5(%arg0: i32) -> (i32, i32) {
    %c0_i32 = arith.constant 0 : i32
    %c0_i32_0 = arith.constant 0 : i32
    %c0_i32_1 = arith.constant 0 : i32
    return %c0_i32, %c0_i32_0 : i32, i32
  }
  func.func @transform_6(%arg0: i32) -> (i32, i32, i32) {
    %c0_i32 = arith.constant 0 : i32
    %c0_i32_0 = arith.constant 0 : i32
    %c0_i32_1 = arith.constant 0 : i32
    return %arg0, %c0_i32, %c0_i32_0 : i32, i32, i32
  }
}

</mosaic_0001>

<bundles_post_ra>
// kernel: tpu_custom_call.1
= control target key start
LH: loop header
LB: loop body
LE: loop exit
PB: predicated region body
PF: predicated region fallthrough
CT: control target
= control target key end

     0   :  { %v51_v1 = vlaneseq  ;;  %v3971_v2 = vmov 0.0   ;;  %vm3972_vm0 = vmmov 0   ;;  %v3973_v4 = vmov 1966171168   ;;  %s4768_s0 = inlined_call_operand.vmem [shape: f32[28,8,16], index: 0, kind: input, shape index: {}]   ;;  %s4769_s1 = inlined_call_operand.vmem [shape: f32[8,16], index: 1, kind: input, shape index: {}]   ;;  %s4770_s2 = inlined_call_operand.vmem [shape: bf16[16,32], index: 2, kind: input, shape index: {}]   ;;  %s4771_s3 = inlined_call_operand.vmem [shape: f32[1,32], index: 3, kind: input, shape index: {}]   ;;  %s4772_s4 = inlined_call_operand.vmem [shape: bf16[32,16], index: 4, kind: input, shape index: {}]   ;;  %s4773_s5 = inlined_call_operand.vmem [shape: f32[1,16], index: 5, kind: input, shape index: {}]   ;;  %s4774_s6 = inlined_call_operand.hbm [shape: f32[8,8,16], index: 6, kind: output, shape index: {}]  }
   0x1   :  { %v4015_v0 = vld [vmem:[%s4770_s2] sm:$0xff]   ;;  %3484 = vmatprep.subr.bf16.mxu0 %v3971_v2  ;;  %3490 = vmatprep.subr.bf16.mxu1 %v3971_v2  ;;  %v49_v5 = vunpack.c.l.s4 %v3973_v4  ;;  %vm127_vm1 = vcmask 130048  }
   0x2   :  { %v4021_v3 = vld [vmem:[%s4769_s1] sm:$0xff]  ;;  %3485 = vmatpush3.bf16.msra.mxu0 %v4015_v0  ;;  %3486 = vmatprep.mubr.msk.bf16.mxu0 %vm3972_vm0, %v3971_v2  ;;  %v52_v6 = vshrl.u32 %v51_v1, 7 }
   0x3   :  { %v120_v7 = vpack.c.bf16 %v4021_v3, %v4021_v3  ;;  %3494 = vmatprep.mubr.msk.bf16.mxu1 %vm3972_vm0, %v3971_v2  ;;  %3498 = vmatprep.subr.bf16.mxu0 %v3971_v2  ;;  %v47_v8 = vcombine.high %v4021_v3, %v4021_v3  ;;  %v50_v9 = vunpack.c.0.s8 %v49_v5 }
   0x4   :  { %11 = vsyncpa [#allocation3], 0  ;;  %vm104_vm2 = vcmask 122880   ;;  %v4059_v23 = vld [vmem:[%s4772_s4] sm:$0xff]   ;;  %v4066_v24 = vld [vmem:[%s4772_s4 + $0x8] sm:$0xff]   ;;  %vm185_vm3 = vcmask 261120  }
   0x5   :  { %3487 = vmatmul.mubr.msk.bf16.vlgmr.msra.gmra.mrb[0].mxu0 %vm127_vm1, %v120_v7  ;;  %v4035_v10 = vsub.s32 %v50_v9, %v52_v6  ;;  %3491 = vmatpush3.bf16.msra.mxu1 %v4059_v23  ;;  %v4073_v25 = vld [vmem:[%s4771_s3] ss:$0 sm:$0xff]  ;;  %v4109_v50 = vld [vmem:[%s4768_s0 + $0x10] sm:$0xff]  ;;  %v3260_v52 = vld [vmem:[%s4768_s0 + $0x18] sm:$0xff] }
   0x6   :  { %3499 = vmatpush3.bf16.msra.mxu0 %v4015_v0  ;;  %3500 = vmatprep.mubr.msk.bf16.mxu0 %vm3972_vm0, %v3971_v2  ;;  %v4086_v33 = vld [vmem:[%s4773_s5] ss:$0 sm:$0xff] }
   0x7   :  { %3512 = vmatprep.subr.bf16.mxu0 %v3971_v2  ;;  %v54_v11 = vrot.slane %v4021_v3, %v4035_v10  ;;  %v61_v12 = vrot.slane %v47_v8, %v4035_v10  ;;  %3492 = vmatprep.subr.bf16.mxu1 %v3971_v2  ;;  %v113_v34 = vld [vmem:[%s4768_s0] sm:$0xff] }
   0x9   :  { %v62_v13 = vcombine.high %v54_v11, %v54_v11  ;;  %v63_v14 = vcombine.high %v61_v12, %v61_v12  ;;  %v70_v15 = vrot.slane %v54_v11, %v4035_v10  ;;  %v77_v16 = vrot.slane %v61_v12, %v4035_v10  ;;  %3493 = vmatpush3.bf16.msra.mxu1 %v4066_v24  ;;  %v3258_v11 = vld [vmem:[%s4768_s0 + $0x8] sm:$0xff] }
   0xa   :  { %3504 = vmatprep.subr.bf16.mxu1 %v3971_v2 }
   0xb   :  { %v84_v17 = vrot.slane %v62_v13, %v4035_v10  ;;  %v91_v18 = vrot.slane %v63_v14, %v4035_v10  ;;  %v92_v19 = vcombine.high %v70_v15, %v70_v15  ;;  %v93_v20 = vcombine.high %v77_v16, %v77_v16  ;;  %105 = vst.msk [vmem:[#allocation2] sm:$0x1] %vm104_vm2, %v70_v15 }
   0xc   :  { %109 = vst.msk [vmem:[#allocation2 + $0x20] sm:$0x1] %vm104_vm2, %v77_v16 }
   0xd   :  { %v94_v21 = vcombine.high %v84_v17, %v84_v17  ;;  %v95_v22 = vcombine.high %v91_v18, %v91_v18  ;;  %106 = vst.msk [vmem:[#allocation2 + $0x8] sm:$0x1] %vm104_vm2, %v84_v17  ;;  %107 = vst.msk [vmem:[#allocation2 + $0x10] sm:$0x1] %vm104_vm2, %v92_v19 }
   0xe   :  { %110 = vst.msk [vmem:[#allocation2 + $0x28] sm:$0x1] %vm104_vm2, %v91_v18  ;;  %111 = vst.msk [vmem:[#allocation2 + $0x30] sm:$0x1] %vm104_vm2, %v93_v20 }
   0xf   :  { %108 = vst.msk [vmem:[#allocation2 + $0x18] sm:$0x1] %vm104_vm2, %v94_v21  ;;  %112 = vst.msk [vmem:[#allocation2 + $0x38] sm:$0x1] %vm104_vm2, %v95_v22 }
  0xd8   :  { %v165_v26 = vpop.f32.mrb[0].mxu0 }
  0xd9   :  { %v166_v27 = vadd.f32 %v4073_v25, %v165_v26  ;;  %v3488_v28 = vpop.f32.mrb[1].mxu0 }
  0xda   :  { %v168_v29 = vpop.f32.mrb[2].mxu0 }
  0xdb   :  { %3886 = vtanh.f32 %v166_v27  ;;  %v3489_v30 = vpop.f32.mrb[3].mxu0 }
  0xe5   :  { %v3887_v31 = vpop.eup %3886 }
  0xe6   :  { %v172_v32 = vpack.c.bf16 %v3887_v31, %v3887_v31 }
  0xe8   :  { %3495 = vmatmul.mubr.msk.bf16.vlgmr.msra.gmra.mrb[0].mxu1 %vm185_vm3, %v172_v32 }
  0xe9   :  { %3505 = vmatpush3.bf16.msra.mxu1 %v4059_v23  ;;  %3508 = vmatprep.mubr.msk.bf16.mxu1 %vm3972_vm0, %v3971_v2 }
  0xea   :  { %3506 = vmatprep.subr.bf16.mxu1 %v3971_v2 }
  0xed   :  { %3507 = vmatpush3.bf16.msra.mxu1 %v4066_v24 }
  0xee   :  { %3518 = vmatprep.subr.bf16.mxu1 %v3971_v2 }
 0x1bb   :  { %v223_v35 = vpop.f32.mrb[0].mxu1 }
 0x1bc   :  { %v224_v36 = vadd.f32 %v4086_v33, %v223_v35  ;;  %v3496_v37 = vpop.f32.mrb[1].mxu1 }
 0x1bd   :  { %v226_v38 = vpop.f32.mrb[2].mxu1 }
 0x1be   :  { %v231_v39 = vmul.f32 %v224_v36, %v113_v34  ;;  %v3497_v40 = vpop.f32.mrb[3].mxu1  ;;  %v229_v51 = vmul.f32 %v4109_v50, %v224_v36 }
 0x1c0   :  { %v232_v41 = vadd.f32 %v231_v39, %v4021_v3  ;;  %v230_v57 = vadd.f32 %v229_v51, %v4021_v3 }
 0x1c2   :  { %v233_v42 = vpack.c.bf16 %v232_v41, %v232_v41 }
 0x1c4   :  { %3501 = vmatmul.mubr.msk.bf16.vlgmr.msra.gmra.mrb[4].mxu0 %vm127_vm1, %v233_v42 }
 0x1c5   :  { %3513 = vmatpush3.bf16.msra.mxu0 %v4015_v0  ;;  %3514 = vmatprep.mubr.msk.bf16.mxu0 %vm3972_vm0, %v3971_v2 }
 0x1c6   :  { %3526 = vmatprep.subr.bf16.mxu0 %v3971_v2 }
 0x297   :  { %v271_v43 = vpop.f32.mrb[4].mxu0 }
 0x298   :  { %v272_v44 = vadd.f32 %v4073_v25, %v271_v43  ;;  %v3502_v45 = vpop.f32.mrb[5].mxu0 }
 0x299   :  { %v274_v46 = vpop.f32.mrb[6].mxu0 }
 0x29a   :  { %3888 = vtanh.f32 %v272_v44  ;;  %v3503_v47 = vpop.f32.mrb[7].mxu0 }
 0x2a4   :  { %v3889_v48 = vpop.eup %3888 }
 0x2a5   :  { %v278_v49 = vpack.c.bf16 %v3889_v48, %v3889_v48 }
 0x2a7   :  { %3509 = vmatmul.mubr.msk.bf16.vlgmr.msra.gmra.mrb[4].mxu1 %vm185_vm3, %v278_v49 }
 0x2a8   :  { %3519 = vmatpush3.bf16.msra.mxu1 %v4059_v23  ;;  %3522 = vmatprep.mubr.msk.bf16.mxu1 %vm3972_vm0, %v3971_v2 }
 0x2a9   :  { %3520 = vmatprep.subr.bf16.mxu1 %v3971_v2 }
 0x2ac   :  { %3521 = vmatpush3.bf16.msra.mxu1 %v4066_v24 }
 0x2ad   :  { %3532 = vmatprep.subr.bf16.mxu1 %v3971_v2 }
 0x37a   :  { %v316_v53 = vpop.f32.mrb[4].mxu1 }
 0x37b   :  { %v317_v54 = vadd.f32 %v4086_v33, %v316_v53  ;;  %v3510_v55 = vpop.f32.mrb[5].mxu1 }
 0x37c   :  { %v319_v56 = vpop.f32.mrb[6].mxu1 }
 0x37d   :  { %v322_v58 = vmul.f32 %v3260_v52, %v317_v54  ;;  %v324_v59 = vmul.f32 %v317_v54, %v113_v34  ;;  %v3511_v60 = vpop.f32.mrb[7].mxu1 }
 0x37e   :  { %v3272_v60 = vld [vmem:[%s4768_s0 + $0x20] sm:$0xff] }
 0x37f   :  { %v323_v61 = vadd.f32 %v322_v58, %v230_v57  ;;  %v325_v62 = vadd.f32 %v324_v59, %v4021_v3 }
 0x381   :  { %v326_v63 = vpack.c.bf16 %v325_v62, %v325_v62 }
 0x383   :  { %3515 = vmatmul.mubr.msk.bf16.vlgmr.msra.gmra.mrb[8].mxu0 %vm127_vm1, %v326_v63 }
 0x384   :  { %3527 = vmatpush3.bf16.msra.mxu0 %v4015_v0  ;;  %3528 = vmatprep.mubr.msk.bf16.mxu0 %vm3972_vm0, %v3971_v2 }
 0x385   :  { %3540 = vmatprep.subr.bf16.mxu0 %v3971_v2 }
 0x456   :  { %v364_v1 = vpop.f32.mrb[8].mxu0 }
 0x457   :  { %v365_v4 = vadd.f32 %v4073_v25, %v364_v1  ;;  %v3516_v5 = vpop.f32.mrb[9].mxu0 }
 0x458   :  { %v367_v6 = vpop.f32.mrb[10].mxu0 }
 0x459   :  { %3890 = vtanh.f32 %v365_v4  ;;  %v3517_v7 = vpop.f32.mrb[11].mxu0 }
 0x463   :  { %v3891_v8 = vpop.eup %3890 }
 0x464   :  { %v371_v9 = vpack.c.bf16 %v3891_v8, %v3891_v8 }
 0x466   :  { %3523 = vmatmul.mubr.msk.bf16.vlgmr.msra.gmra.mrb[8].mxu1 %vm185_vm3, %v371_v9 }
 0x467   :  { %3533 = vmatpush3.bf16.msra.mxu1 %v4059_v23  ;;  %3536 = vmatprep.mubr.msk.bf16.mxu1 %vm3972_vm0, %v3971_v2 }
 0x468   :  { %3534 = vmatprep.subr.bf16.mxu1 %v3971_v2 }
 0x46b   :  { %3535 = vmatpush3.bf16.msra.mxu1 %v4066_v24 }
 0x46c   :  { %3546 = vmatprep.subr.bf16.mxu1 %v3971_v2 }
 0x539   :  { %v409_v12 = vpop.f32.mrb[8].mxu1 }
 0x53a   :  { %v410_v13 = vadd.f32 %v4086_v33, %v409_v12  ;;  %v3524_v14 = vpop.f32.mrb[9].mxu1 }
 0x53b   :  { %v412_v15 = vpop.f32.mrb[10].mxu1 }
 0x53c   :  { %v415_v16 = vmul.f32 %v3260_v52, %v410_v13  ;;  %v417_v17 = vmul.f32 %v3258_v11, %v410_v13  ;;  %v3525_v18 = vpop.f32.mrb[11].mxu1 }
 0x53d   :  { %v3275_v18 = vld [vmem:[%s4768_s0 + $0x38] sm:$0xff] }
 0x53e   :  { %v416_v19 = vadd.f32 %v415_v16, %v323_v61  ;;  %v418_v20 = vadd.f32 %v417_v17, %v4021_v3  ;;  %v4206_v16 = vld [vmem:[%s4768_s0 + $0x30] sm:$0xff] }
 0x540   :  { %v419_v21 = vpack.c.bf16 %v418_v20, %v418_v20 }
 0x542   :  { %3529 = vmatmul.mubr.msk.bf16.vlgmr.msra.gmra.mrb[12].mxu0 %vm127_vm1, %v419_v21 }
 0x543   :  { %3541 = vmatpush3.bf16.msra.mxu0 %v4015_v0  ;;  %3542 = vmatprep.mubr.msk.bf16.mxu0 %vm3972_vm0, %v3971_v2 }
 0x544   :  { %3554 = vmatprep.subr.bf16.mxu0 %v3971_v2 }
 0x615   :  { %v457_v22 = vpop.f32.mrb[12].mxu0 }
 0x616   :  { %v458_v26 = vadd.f32 %v4073_v25, %v457_v22  ;;  %v3530_v27 = vpop.f32.mrb[13].mxu0 }
 0x617   :  { %v460_v28 = vpop.f32.mrb[14].mxu0 }
 0x618   :  { %3892 = vtanh.f32 %v458_v26  ;;  %v3531_v29 = vpop.f32.mrb[15].mxu0 }
 0x622   :  { %v3893_v30 = vpop.eup %3892 }
 0x623   :  { %v464_v31 = vpack.c.bf16 %v3893_v30, %v3893_v30 }
 0x625   :  { %3537 = vmatmul.mubr.msk.bf16.vlgmr.msra.gmra.mrb[12].mxu1 %vm185_vm3, %v464_v31 }
 0x626   :  { %3547 = vmatpush3.bf16.msra.mxu1 %v4059_v23  ;;  %3550 = vmatprep.mubr.msk.bf16.mxu1 %vm3972_vm0, %v3971_v2 }
 0x627   :  { %3548 = vmatprep.subr.bf16.mxu1 %v3971_v2 }
 0x62a   :  { %3549 = vmatpush3.bf16.msra.mxu1 %v4066_v24 }
 0x62b   :  { %3560 = vmatprep.subr.bf16.mxu1 %v3971_v2 }
 0x6f8   :  { %v502_v3 = vpop.f32.mrb[12].mxu1 }
 0x6f9   :  { %v503_v32 = vadd.f32 %v4086_v33, %v502_v3  ;;  %v3538_v34 = vpop.f32.mrb[13].mxu1 }
 0x6fa   :  { %v505_v35 = vpop.f32.mrb[14].mxu1 }
 0x6fb   :  { %v508_v36 = vmul.f32 %v4109_v50, %v503_v32  ;;  %v3539_v37 = vpop.f32.mrb[15].mxu1 }
 0x6fd   :  { %v4151_v38 = vadd.f32 %v508_v36, %v416_v19 }
 0x6ff   :  { %v511_v39 = vcombine.high %v4151_v38, %v4151_v38  ;;  %v518_v40 = vrot.slane %v4151_v38, %v4035_v10  ;;  %v584_v41 = vpack.c.bf16 %v4151_v38, %v4151_v38 }
 0x701   :  { %v525_v42 = vrot.slane %v511_v39, %v4035_v10  ;;  %v526_v43 = vcombine.high %v518_v40, %v518_v40  ;;  %v534_v44 = vrot.slane %v518_v40, %v4035_v10  ;;  %3543 = vmatmul.mubr.msk.bf16.vlgmr.msra.gmra.mrb[16].mxu0 %vm127_vm1, %v584_v41  ;;  %v3273_v41 = vld [vmem:[%s4768_s0 + $0x28] sm:$0xff] }
 0x702   :  { %3555 = vmatpush3.bf16.msra.mxu0 %v4015_v0  ;;  %3556 = vmatprep.mubr.msk.bf16.mxu0 %vm3972_vm0, %v3971_v2 }
 0x703   :  { %v527_v45 = vcombine.high %v525_v42, %v525_v42  ;;  %v541_v46 = vrot.slane %v525_v42, %v4035_v10  ;;  %v548_v47 = vrot.slane %v526_v43, %v4035_v10  ;;  %v556_v48 = vcombine.high %v534_v44, %v534_v44  ;;  %568 = vst.msk [vmem:[#allocation2 + $0x1] sm:$0x1] %vm104_vm2, %v534_v44 }
 0x704   :  { %3568 = vmatprep.subr.bf16.mxu0 %v3971_v2 }
 0x705   :  { %v555_v49 = vrot.slane %v527_v45, %v4035_v10  ;;  %v557_v50 = vcombine.high %v541_v46, %v541_v46  ;;  %v558_v51 = vcombine.high %v548_v47, %v548_v47  ;;  %569 = vst.msk [vmem:[#allocation2 + $0x9] sm:$0x1] %vm104_vm2, %v548_v47  ;;  %570 = vst.msk [vmem:[#allocation2 + $0x11] sm:$0x1] %vm104_vm2, %v556_v48 }
 0x706   :  { %572 = vst.msk [vmem:[#allocation2 + $0x21] sm:$0x1] %vm104_vm2, %v541_v46 }
 0x707   :  { %v559_v52 = vcombine.high %v555_v49, %v555_v49  ;;  %571 = vst.msk [vmem:[#allocation2 + $0x19] sm:$0x1] %vm104_vm2, %v558_v51  ;;  %573 = vst.msk [vmem:[#allocation2 + $0x29] sm:$0x1] %vm104_vm2, %v555_v49 }
 0x708   :  { %574 = vst.msk [vmem:[#allocation2 + $0x31] sm:$0x1] %vm104_vm2, %v557_v50 }
 0x709   :  { %575 = vst.msk [vmem:[#allocation2 + $0x39] sm:$0x1] %vm104_vm2, %v559_v52 }
 0x7d4   :  { %v622_v53 = vpop.f32.mrb[16].mxu0 }
 0x7d5   :  { %v623_v54 = vadd.f32 %v4073_v25, %v622_v53  ;;  %v3544_v55 = vpop.f32.mrb[17].mxu0 }
 0x7d6   :  { %v625_v56 = vpop.f32.mrb[18].mxu0 }
 0x7d7   :  { %3894 = vtanh.f32 %v623_v54  ;;  %v3545_v57 = vpop.f32.mrb[19].mxu0 }
 0x7e1   :  { %v3895_v58 = vpop.eup %3894 }
 0x7e2   :  { %v629_v59 = vpack.c.bf16 %v3895_v58, %v3895_v58 }
 0x7e4   :  { %3551 = vmatmul.mubr.msk.bf16.vlgmr.msra.gmra.mrb[16].mxu1 %vm185_vm3, %v629_v59 }
 0x7e5   :  { %3561 = vmatpush3.bf16.msra.mxu1 %v4059_v23  ;;  %3564 = vmatprep.mubr.msk.bf16.mxu1 %vm3972_vm0, %v3971_v2 }
 0x7e6   :  { %3562 = vmatprep.subr.bf16.mxu1 %v3971_v2 }
 0x7e9   :  { %3563 = vmatpush3.bf16.msra.mxu1 %v4066_v24 }
 0x7ea   :  { %3574 = vmatprep.subr.bf16.mxu1 %v3971_v2 }
 0x8b7   :  { %v667_v61 = vpop.f32.mrb[16].mxu1 }
 0x8b8   :  { %v668_v62 = vadd.f32 %v4086_v33, %v667_v61  ;;  %v3552_v63 = vpop.f32.mrb[17].mxu1 }
 0x8b9   :  { %v670_v1 = vpop.f32.mrb[18].mxu1 }
 0x8ba   :  { %v675_v4 = vmul.f32 %v3272_v60, %v668_v62  ;;  %v3553_v5 = vpop.f32.mrb[19].mxu1  ;;  %v673_v17 = vmul.f32 %v4206_v16, %v668_v62 }
 0x8bc   :  { %v676_v6 = vadd.f32 %v675_v4, %v4151_v38  ;;  %v674_v26 = vadd.f32 %v673_v17, %v4151_v38 }
 0x8be   :  { %v677_v7 = vpack.c.bf16 %v676_v6, %v676_v6 }
 0x8c0   :  { %3557 = vmatmul.mubr.msk.bf16.vlgmr.msra.gmra.mrb[20].mxu0 %vm127_vm1, %v677_v7 }
 0x8c1   :  { %3569 = vmatpush3.bf16.msra.mxu0 %v4015_v0  ;;  %3570 = vmatprep.mubr.msk.bf16.mxu0 %vm3972_vm0, %v3971_v2 }
 0x8c2   :  { %3582 = vmatprep.subr.bf16.mxu0 %v3971_v2 }
 0x993   :  { %v715_v8 = vpop.f32.mrb[20].mxu0 }
 0x994   :  { %v716_v9 = vadd.f32 %v4073_v25, %v715_v8  ;;  %v3558_v11 = vpop.f32.mrb[21].mxu0 }
 0x995   :  { %v718_v12 = vpop.f32.mrb[22].mxu0 }
 0x996   :  { %3896 = vtanh.f32 %v716_v9  ;;  %v3559_v13 = vpop.f32.mrb[23].mxu0 }
 0x9a0   :  { %v3897_v14 = vpop.eup %3896 }
 0x9a1   :  { %v722_v15 = vpack.c.bf16 %v3897_v14, %v3897_v14 }
 0x9a3   :  { %3565 = vmatmul.mubr.msk.bf16.vlgmr.msra.gmra.mrb[20].mxu1 %vm185_vm3, %v722_v15 }
 0x9a4   :  { %3575 = vmatpush3.bf16.msra.mxu1 %v4059_v23  ;;  %3578 = vmatprep.mubr.msk.bf16.mxu1 %vm3972_vm0, %v3971_v2 }
 0x9a5   :  { %3576 = vmatprep.subr.bf16.mxu1 %v3971_v2 }
 0x9a8   :  { %3577 = vmatpush3.bf16.msra.mxu1 %v4066_v24 }
 0x9a9   :  { %3588 = vmatprep.subr.bf16.mxu1 %v3971_v2 }
 0xa76   :  { %v760_v19 = vpop.f32.mrb[20].mxu1 }
 0xa77   :  { %v761_v20 = vadd.f32 %v4086_v33, %v760_v19  ;;  %v3566_v21 = vpop.f32.mrb[21].mxu1 }
 0xa78   :  { %v763_v22 = vpop.f32.mrb[22].mxu1 }
 0xa79   :  { %v766_v27 = vmul.f32 %v3275_v18, %v761_v20  ;;  %v768_v28 = vmul.f32 %v3272_v60, %v761_v20  ;;  %v3567_v29 = vpop.f32.mrb[23].mxu1 }
 0xa7a   :  { %v3284_v29 = vld [vmem:[%s4768_s0 + $0x40] sm:$0xff] }
 0xa7b   :  { %v767_v30 = vadd.f32 %v766_v27, %v674_v26  ;;  %v769_v31 = vadd.f32 %v768_v28, %v4151_v38 }
 0xa7d   :  { %v770_v3 = vpack.c.bf16 %v769_v31, %v769_v31 }
 0xa7f   :  { %3571 = vmatmul.mubr.msk.bf16.vlgmr.msra.gmra.mrb[24].mxu0 %vm127_vm1, %v770_v3 }
 0xa80   :  { %3583 = vmatpush3.bf16.msra.mxu0 %v4015_v0  ;;  %3584 = vmatprep.mubr.msk.bf16.mxu0 %vm3972_vm0, %v3971_v2 }
 0xa81   :  { %3596 = vmatprep.subr.bf16.mxu0 %v3971_v2 }
 0xb52   :  { %v808_v32 = vpop.f32.mrb[24].mxu0 }
 0xb53   :  { %v809_v34 = vadd.f32 %v4073_v25, %v808_v32  ;;  %v3572_v35 = vpop.f32.mrb[25].mxu0 }
 0xb54   :  { %v811_v36 = vpop.f32.mrb[26].mxu0 }
 0xb55   :  { %3898 = vtanh.f32 %v809_v34  ;;  %v3573_v37 = vpop.f32.mrb[27].mxu0 }
 0xb5f   :  { %v3899_v39 = vpop.eup %3898 }
 0xb60   :  { %v815_v40 = vpack.c.bf16 %v3899_v39, %v3899_v39 }
 0xb62   :  { %3579 = vmatmul.mubr.msk.bf16.vlgmr.msra.gmra.mrb[24].mxu1 %vm185_vm3, %v815_v40 }
 0xb63   :  { %3589 = vmatpush3.bf16.msra.mxu1 %v4059_v23  ;;  %3592 = vmatprep.mubr.msk.bf16.mxu1 %vm3972_vm0, %v3971_v2 }
 0xb64   :  { %3590 = vmatprep.subr.bf16.mxu1 %v3971_v2 }
 0xb67   :  { %3591 = vmatpush3.bf16.msra.mxu1 %v4066_v24 }
 0xb68   :  { %3602 = vmatprep.subr.bf16.mxu1 %v3971_v2 }
 0xc35   :  { %v853_v42 = vpop.f32.mrb[24].mxu1 }
 0xc36   :  { %v854_v43 = vadd.f32 %v4086_v33, %v853_v42  ;;  %v3580_v44 = vpop.f32.mrb[25].mxu1 }
 0xc37   :  { %v856_v45 = vpop.f32.mrb[26].mxu1 }
 0xc38   :  { %v859_v46 = vmul.f32 %v3275_v18, %v854_v43  ;;  %v861_v47 = vmul.f32 %v3273_v41, %v854_v43  ;;  %v3581_v48 = vpop.f32.mrb[27].mxu1 }
 0xc39   :  { %v3287_v48 = vld [vmem:[%s4768_s0 + $0x58] sm:$0xff] }
 0xc3a   :  { %v860_v49 = vadd.f32 %v859_v46, %v767_v30  ;;  %v862_v50 = vadd.f32 %v861_v47, %v4151_v38  ;;  %v4303_v46 = vld [vmem:[%s4768_s0 + $0x50] sm:$0xff] }
 0xc3c   :  { %v863_v51 = vpack.c.bf16 %v862_v50, %v862_v50 }
 0xc3e   :  { %3585 = vmatmul.mubr.msk.bf16.vlgmr.msra.gmra.mrb[28].mxu0 %vm127_vm1, %v863_v51 }
 0xc3f   :  { %3597 = vmatpush3.bf16.msra.mxu0 %v4015_v0  ;;  %3598 = vmatprep.mubr.msk.bf16.mxu0 %vm3972_vm0, %v3971_v2 }
 0xc40   :  { %3610 = vmatprep.subr.bf16.mxu0 %v3971_v2 }
 0xd11   :  { %v901_v52 = vpop.f32.mrb[28].mxu0 }
 0xd12   :  { %v902_v53 = vadd.f32 %v4073_v25, %v901_v52  ;;  %v3586_v54 = vpop.f32.mrb[29].mxu0 }
 0xd13   :  { %v904_v55 = vpop.f32.mrb[30].mxu0 }
 0xd14   :  { %3900 = vtanh.f32 %v902_v53  ;;  %v3587_v56 = vpop.f32.mrb[31].mxu0 }
 0xd1e   :  { %v3901_v57 = vpop.eup %3900 }
 0xd1f   :  { %v908_v58 = vpack.c.bf16 %v3901_v57, %v3901_v57 }
 0xd21   :  { %3593 = vmatmul.mubr.msk.bf16.vlgmr.msra.gmra.mrb[28].mxu1 %vm185_vm3, %v908_v58 }
 0xd22   :  { %3603 = vmatpush3.bf16.msra.mxu1 %v4059_v23  ;;  %3606 = vmatprep.mubr.msk.bf16.mxu1 %vm3972_vm0, %v3971_v2 }
 0xd23   :  { %3604 = vmatprep.subr.bf16.mxu1 %v3971_v2 }
 0xd26   :  { %3605 = vmatpush3.bf16.msra.mxu1 %v4066_v24 }
 0xd27   :  { %3616 = vmatprep.subr.bf16.mxu1 %v3971_v2 }
 0xdf4   :  { %v946_v38 = vpop.f32.mrb[28].mxu1 }
 0xdf5   :  { %v947_v59 = vadd.f32 %v4086_v33, %v946_v38  ;;  %v3594_v60 = vpop.f32.mrb[29].mxu1 }
 0xdf6   :  { %v949_v61 = vpop.f32.mrb[30].mxu1 }
 0xdf7   :  { %v952_v62 = vmul.f32 %v4206_v16, %v947_v59  ;;  %v3595_v63 = vpop.f32.mrb[31].mxu1 }
 0xdf9   :  { %v4248_v1 = vadd.f32 %v952_v62, %v860_v49 }
 0xdfb   :  { %v955_v4 = vcombine.high %v4248_v1, %v4248_v1  ;;  %v962_v5 = vrot.slane %v4248_v1, %v4035_v10  ;;  %v1028_v6 = vpack.c.bf16 %v4248_v1, %v4248_v1 }
 0xdfd   :  { %v969_v7 = vrot.slane %v955_v4, %v4035_v10  ;;  %v970_v8 = vcombine.high %v962_v5, %v962_v5  ;;  %v978_v9 = vrot.slane %v962_v5, %v4035_v10  ;;  %3599 = vmatmul.mubr.msk.bf16.vlgmr.msra.gmra.mrb[32].mxu0 %vm127_vm1, %v1028_v6  ;;  %v3285_v6 = vld [vmem:[%s4768_s0 + $0x48] sm:$0xff] }
 0xdfe   :  { %3611 = vmatpush3.bf16.msra.mxu0 %v4015_v0  ;;  %3612 = vmatprep.mubr.msk.bf16.mxu0 %vm3972_vm0, %v3971_v2 }
 0xdff   :  { %v971_v11 = vcombine.high %v969_v7, %v969_v7  ;;  %v985_v12 = vrot.slane %v969_v7, %v4035_v10  ;;  %v992_v13 = vrot.slane %v970_v8, %v4035_v10  ;;  %v1000_v14 = vcombine.high %v978_v9, %v978_v9  ;;  %1012 = vst.msk [vmem:[#allocation2 + $0x2] sm:$0x1] %vm104_vm2, %v978_v9 }
 0xe00   :  { %3624 = vmatprep.subr.bf16.mxu0 %v3971_v2 }
 0xe01   :  { %v999_v15 = vrot.slane %v971_v11, %v4035_v10  ;;  %v1001_v16 = vcombine.high %v985_v12, %v985_v12  ;;  %v1002_v17 = vcombine.high %v992_v13, %v992_v13  ;;  %1013 = vst.msk [vmem:[#allocation2 + $0xa] sm:$0x1] %vm104_vm2, %v992_v13  ;;  %1014 = vst.msk [vmem:[#allocation2 + $0x12] sm:$0x1] %vm104_vm2, %v1000_v14 }
 0xe02   :  { %1016 = vst.msk [vmem:[#allocation2 + $0x22] sm:$0x1] %vm104_vm2, %v985_v12 }
 0xe03   :  { %v1003_v18 = vcombine.high %v999_v15, %v999_v15  ;;  %1015 = vst.msk [vmem:[#allocation2 + $0x1a] sm:$0x1] %vm104_vm2, %v1002_v17  ;;  %1017 = vst.msk [vmem:[#allocation2 + $0x2a] sm:$0x1] %vm104_vm2, %v999_v15 }
 0xe04   :  { %1018 = vst.msk [vmem:[#allocation2 + $0x32] sm:$0x1] %vm104_vm2, %v1001_v16 }
 0xe05   :  { %1019 = vst.msk [vmem:[#allocation2 + $0x3a] sm:$0x1] %vm104_vm2, %v1003_v18 }
 0xed0   :  { %v1066_v19 = vpop.f32.mrb[32].mxu0 }
 0xed1   :  { %v1067_v20 = vadd.f32 %v4073_v25, %v1066_v19  ;;  %v3600_v21 = vpop.f32.mrb[33].mxu0 }
 0xed2   :  { %v1069_v22 = vpop.f32.mrb[34].mxu0 }
 0xed3   :  { %3902 = vtanh.f32 %v1067_v20  ;;  %v3601_v26 = vpop.f32.mrb[35].mxu0 }
 0xedd   :  { %v3903_v27 = vpop.eup %3902 }
 0xede   :  { %v1073_v28 = vpack.c.bf16 %v3903_v27, %v3903_v27 }
 0xee0   :  { %3607 = vmatmul.mubr.msk.bf16.vlgmr.msra.gmra.mrb[32].mxu1 %vm185_vm3, %v1073_v28 }
 0xee1   :  { %3617 = vmatpush3.bf16.msra.mxu1 %v4059_v23  ;;  %3620 = vmatprep.mubr.msk.bf16.mxu1 %vm3972_vm0, %v3971_v2 }
 0xee2   :  { %3618 = vmatprep.subr.bf16.mxu1 %v3971_v2 }
 0xee5   :  { %3619 = vmatpush3.bf16.msra.mxu1 %v4066_v24 }
 0xee6   :  { %3630 = vmatprep.subr.bf16.mxu1 %v3971_v2 }
 0xfb3   :  { %v1111_v30 = vpop.f32.mrb[32].mxu1 }
 0xfb4   :  { %v1112_v31 = vadd.f32 %v4086_v33, %v1111_v30  ;;  %v3608_v3 = vpop.f32.mrb[33].mxu1 }
 0xfb5   :  { %v1114_v32 = vpop.f32.mrb[34].mxu1 }
 0xfb6   :  { %v1119_v34 = vmul.f32 %v3284_v29, %v1112_v31  ;;  %v3609_v35 = vpop.f32.mrb[35].mxu1  ;;  %v1117_v47 = vmul.f32 %v4303_v46, %v1112_v31 }
 0xfb8   :  { %v1120_v36 = vadd.f32 %v1119_v34, %v4248_v1  ;;  %v1118_v53 = vadd.f32 %v1117_v47, %v4248_v1 }
 0xfba   :  { %v1121_v37 = vpack.c.bf16 %v1120_v36, %v1120_v36 }
 0xfbc   :  { %3613 = vmatmul.mubr.msk.bf16.vlgmr.msra.gmra.mrb[36].mxu0 %vm127_vm1, %v1121_v37 }
 0xfbd   :  { %3625 = vmatpush3.bf16.msra.mxu0 %v4015_v0  ;;  %3626 = vmatprep.mubr.msk.bf16.mxu0 %vm3972_vm0, %v3971_v2 }
 0xfbe   :  { %3638 = vmatprep.subr.bf16.mxu0 %v3971_v2 }
0x108f   :  { %v1159_v39 = vpop.f32.mrb[36].mxu0 }
0x1090   :  { %v1160_v40 = vadd.f32 %v4073_v25, %v1159_v39  ;;  %v3614_v41 = vpop.f32.mrb[37].mxu0 }
0x1091   :  { %v1162_v42 = vpop.f32.mrb[38].mxu0 }
0x1092   :  { %3904 = vtanh.f32 %v1160_v40  ;;  %v3615_v43 = vpop.f32.mrb[39].mxu0 }
0x109c   :  { %v3905_v44 = vpop.eup %3904 }
0x109d   :  { %v1166_v45 = vpack.c.bf16 %v3905_v44, %v3905_v44 }
0x109f   :  { %3621 = vmatmul.mubr.msk.bf16.vlgmr.msra.gmra.mrb[36].mxu1 %vm185_vm3, %v1166_v45 }
0x10a0   :  { %3631 = vmatpush3.bf16.msra.mxu1 %v4059_v23  ;;  %3634 = vmatprep.mubr.msk.bf16.mxu1 %vm3972_vm0, %v3971_v2 }
0x10a1   :  { %3632 = vmatprep.subr.bf16.mxu1 %v3971_v2 }
0x10a4   :  { %3633 = vmatpush3.bf16.msra.mxu1 %v4066_v24 }
0x10a5   :  { %3644 = vmatprep.subr.bf16.mxu1 %v3971_v2 }
0x1172   :  { %v1204_v49 = vpop.f32.mrb[36].mxu1 }
0x1173   :  { %v1205_v50 = vadd.f32 %v4086_v33, %v1204_v49  ;;  %v3622_v51 = vpop.f32.mrb[37].mxu1 }
0x1174   :  { %v1207_v52 = vpop.f32.mrb[38].mxu1 }
0x1175   :  { %v1210_v54 = vmul.f32 %v3287_v48, %v1205_v50  ;;  %v1212_v55 = vmul.f32 %v3284_v29, %v1205_v50  ;;  %v3623_v56 = vpop.f32.mrb[39].mxu1 }
0x1176   :  { %v3296_v56 = vld [vmem:[%s4768_s0 + $0x60] sm:$0xff] }
0x1177   :  { %v1211_v57 = vadd.f32 %v1210_v54, %v1118_v53  ;;  %v1213_v58 = vadd.f32 %v1212_v55, %v4248_v1 }
0x1179   :  { %v1214_v38 = vpack.c.bf16 %v1213_v58, %v1213_v58 }
0x117b   :  { %3627 = vmatmul.mubr.msk.bf16.vlgmr.msra.gmra.mrb[40].mxu0 %vm127_vm1, %v1214_v38 }
0x117c   :  { %3639 = vmatpush3.bf16.msra.mxu0 %v4015_v0  ;;  %3640 = vmatprep.mubr.msk.bf16.mxu0 %vm3972_vm0, %v3971_v2 }
0x117d   :  { %3652 = vmatprep.subr.bf16.mxu0 %v3971_v2 }
0x124e   :  { %v1252_v59 = vpop.f32.mrb[40].mxu0 }
0x124f   :  { %v1253_v60 = vadd.f32 %v4073_v25, %v1252_v59  ;;  %v3628_v61 = vpop.f32.mrb[41].mxu0 }
0x1250   :  { %v1255_v62 = vpop.f32.mrb[42].mxu0 }
0x1251   :  { %3906 = vtanh.f32 %v1253_v60  ;;  %v3629_v63 = vpop.f32.mrb[43].mxu0 }
0x125b   :  { %v3907_v4 = vpop.eup %3906 }
0x125c   :  { %v1259_v5 = vpack.c.bf16 %v3907_v4, %v3907_v4 }
0x125e   :  { %3635 = vmatmul.mubr.msk.bf16.vlgmr.msra.gmra.mrb[40].mxu1 %vm185_vm3, %v1259_v5 }
0x125f   :  { %3645 = vmatpush3.bf16.msra.mxu1 %v4059_v23  ;;  %3648 = vmatprep.mubr.msk.bf16.mxu1 %vm3972_vm0, %v3971_v2 }
0x1260   :  { %3646 = vmatprep.subr.bf16.mxu1 %v3971_v2 }
0x1263   :  { %3647 = vmatpush3.bf16.msra.mxu1 %v4066_v24 }
0x1264   :  { %3658 = vmatprep.subr.bf16.mxu1 %v3971_v2 }
0x1331   :  { %v1297_v7 = vpop.f32.mrb[40].mxu1 }
0x1332   :  { %v1298_v8 = vadd.f32 %v4086_v33, %v1297_v7  ;;  %v3636_v9 = vpop.f32.mrb[41].mxu1 }
0x1333   :  { %v1300_v11 = vpop.f32.mrb[42].mxu1 }
0x1334   :  { %v1303_v12 = vmul.f32 %v3287_v48, %v1298_v8  ;;  %v1305_v13 = vmul.f32 %v3285_v6, %v1298_v8  ;;  %v3637_v14 = vpop.f32.mrb[43].mxu1 }
0x1336   :  { %v1304_v15 = vadd.f32 %v1303_v12, %v1211_v57  ;;  %v1306_v16 = vadd.f32 %v1305_v13, %v4248_v1  ;;  %v3299_v13 = vld [vmem:[%s4768_s0 + $0x78] sm:$0xff] }
0x1338   :  { %v1307_v17 = vpack.c.bf16 %v1306_v16, %v1306_v16 }
0x133a   :  { %3641 = vmatmul.mubr.msk.bf16.vlgmr.msra.gmra.mrb[44].mxu0 %vm127_vm1, %v1307_v17 }
0x133b   :  { %3653 = vmatpush3.bf16.msra.mxu0 %v4015_v0  ;;  %3654 = vmatprep.mubr.msk.bf16.mxu0 %vm3972_vm0, %v3971_v2 }
0x133c   :  { %3666 = vmatprep.subr.bf16.mxu0 %v3971_v2 }
0x140d   :  { %v1345_v18 = vpop.f32.mrb[44].mxu0 }
0x140e   :  { %v1346_v19 = vadd.f32 %v4073_v25, %v1345_v18  ;;  %v3642_v20 = vpop.f32.mrb[45].mxu0 }
0x140f   :  { %v1348_v21 = vpop.f32.mrb[46].mxu0 }
0x1410   :  { %3908 = vtanh.f32 %v1346_v19  ;;  %v3643_v22 = vpop.f32.mrb[47].mxu0 }
0x141a   :  { %v3909_v26 = vpop.eup %3908 }
0x141b   :  { %v1352_v27 = vpack.c.bf16 %v3909_v26, %v3909_v26 }
0x141d   :  { %3649 = vmatmul.mubr.msk.bf16.vlgmr.msra.gmra.mrb[44].mxu1 %vm185_vm3, %v1352_v27 }
0x141e   :  { %3659 = vmatpush3.bf16.msra.mxu1 %v4059_v23  ;;  %3662 = vmatprep.mubr.msk.bf16.mxu1 %vm3972_vm0, %v3971_v2 }
0x141f   :  { %3660 = vmatprep.subr.bf16.mxu1 %v3971_v2 }
0x1422   :  { %3661 = vmatpush3.bf16.msra.mxu1 %v4066_v24 }
0x1423   :  { %3672 = vmatprep.subr.bf16.mxu1 %v3971_v2 }
0x14f0   :  { %v1390_v1 = vpop.f32.mrb[44].mxu1 }
0x14f1   :  { %v1391_v28 = vadd.f32 %v4086_v33, %v1390_v1  ;;  %v3650_v29 = vpop.f32.mrb[45].mxu1  ;;  %v4413_v1 = vld [vmem:[%s4770_s2] sm:$0xff]  }
0x14f2   :  { %v1393_v30 = vpop.f32.mrb[46].mxu1 }
0x14f3   :  { %v1396_v31 = vmul.f32 %v4303_v46, %v1391_v28  ;;  %v3651_v3 = vpop.f32.mrb[47].mxu1 }
0x14f5   :  { %v4345_v32 = vadd.f32 %v1396_v31, %v1304_v15 }
0x14f7   :  { %v1399_v34 = vcombine.high %v4345_v32, %v4345_v32  ;;  %v1406_v35 = vrot.slane %v4345_v32, %v4035_v10  ;;  %v1472_v36 = vpack.c.bf16 %v4345_v32, %v4345_v32 }
0x14f9   :  { %v1413_v37 = vrot.slane %v1399_v34, %v4035_v10  ;;  %v1414_v39 = vcombine.high %v1406_v35, %v1406_v35  ;;  %v1422_v40 = vrot.slane %v1406_v35, %v4035_v10  ;;  %3655 = vmatmul.mubr.msk.bf16.vlgmr.msra.gmra.mrb[48].mxu0 %vm127_vm1, %v1472_v36  ;;  %v3297_v36 = vld [vmem:[%s4768_s0 + $0x68] sm:$0xff] }
0x14fa   :  { %3667 = vmatpush3.bf16.msra.mxu0 %v4015_v0  ;;  %3668 = vmatprep.mubr.msk.bf16.mxu0 %vm3972_vm0, %v3971_v2 }
0x14fb   :  { %v1415_v41 = vcombine.high %v1413_v37, %v1413_v37  ;;  %v1429_v42 = vrot.slane %v1413_v37, %v4035_v10  ;;  %v1436_v43 = vrot.slane %v1414_v39, %v4035_v10  ;;  %v1444_v44 = vcombine.high %v1422_v40, %v1422_v40  ;;  %1456 = vst.msk [vmem:[#allocation2 + $0x3] sm:$0x1] %vm104_vm2, %v1422_v40 }
0x14fc   :  { %3680 = vmatprep.subr.bf16.mxu0 %v3971_v2 }
0x14fd   :  { %v1443_v45 = vrot.slane %v1415_v41, %v4035_v10  ;;  %v1445_v46 = vcombine.high %v1429_v42, %v1429_v42  ;;  %v1446_v47 = vcombine.high %v1436_v43, %v1436_v43  ;;  %1457 = vst.msk [vmem:[#allocation2 + $0xb] sm:$0x1] %vm104_vm2, %v1436_v43  ;;  %1458 = vst.msk [vmem:[#allocation2 + $0x13] sm:$0x1] %vm104_vm2, %v1444_v44 }
0x14fe   :  { %1460 = vst.msk [vmem:[#allocation2 + $0x23] sm:$0x1] %vm104_vm2, %v1429_v42 }
0x14ff   :  { %v1447_v48 = vcombine.high %v1443_v45, %v1443_v45  ;;  %1459 = vst.msk [vmem:[#allocation2 + $0x1b] sm:$0x1] %vm104_vm2, %v1446_v47  ;;  %1461 = vst.msk [vmem:[#allocation2 + $0x2b] sm:$0x1] %vm104_vm2, %v1443_v45 }
0x1500   :  { %1462 = vst.msk [vmem:[#allocation2 + $0x33] sm:$0x1] %vm104_vm2, %v1445_v46 }
0x1501   :  { %1463 = vst.msk [vmem:[#allocation2 + $0x3b] sm:$0x1] %vm104_vm2, %v1447_v48 }
0x15cc   :  { %v1510_v49 = vpop.f32.mrb[48].mxu0 }
0x15cd   :  { %v1511_v50 = vadd.f32 %v4073_v25, %v1510_v49  ;;  %v3656_v51 = vpop.f32.mrb[49].mxu0 }
0x15ce   :  { %v1513_v52 = vpop.f32.mrb[50].mxu0 }
0x15cf   :  { %3910 = vtanh.f32 %v1511_v50  ;;  %v3657_v53 = vpop.f32.mrb[51].mxu0 }
0x15d9   :  { %v3911_v54 = vpop.eup %3910 }
0x15da   :  { %v1517_v55 = vpack.c.bf16 %v3911_v54, %v3911_v54 }
0x15dc   :  { %3663 = vmatmul.mubr.msk.bf16.vlgmr.msra.gmra.mrb[48].mxu1 %vm185_vm3, %v1517_v55 }
0x15dd   :  { %3673 = vmatpush3.bf16.msra.mxu1 %v4059_v23  ;;  %3676 = vmatprep.mubr.msk.bf16.mxu1 %vm3972_vm0, %v3971_v2 }
0x15de   :  { %3674 = vmatprep.subr.bf16.mxu1 %v3971_v2 }
0x15e1   :  { %3675 = vmatpush3.bf16.msra.mxu1 %v4066_v24 }
0x15e2   :  { %3686 = vmatprep.subr.bf16.mxu1 %v3971_v2 }
0x16af   :  { %v1555_v57 = vpop.f32.mrb[48].mxu1 }
0x16b0   :  { %v1556_v58 = vadd.f32 %v4086_v33, %v1555_v57  ;;  %v3664_v38 = vpop.f32.mrb[49].mxu1 }
0x16b1   :  { %v1558_v59 = vpop.f32.mrb[50].mxu1 }
0x16b2   :  { %v1563_v60 = vmul.f32 %v3296_v56, %v1556_v58  ;;  %v3665_v61 = vpop.f32.mrb[51].mxu1 }
0x16b4   :  { %v1564_v62 = vadd.f32 %v1563_v60, %v4345_v32 }
0x16b6   :  { %v1565_v63 = vpack.c.bf16 %v1564_v62, %v1564_v62 }
0x16b8   :  { %3669 = vmatmul.mubr.msk.bf16.vlgmr.msra.gmra.mrb[52].mxu0 %vm127_vm1, %v1565_v63 }
0x16b9   :  { %3681 = vmatpush3.bf16.msra.mxu0 %v4015_v0  ;;  %3682 = vmatprep.mubr.msk.bf16.mxu0 %vm3972_vm0, %v3971_v2  ;;  %v4400_v0 = vld [vmem:[%s4768_s0 + $0x70] sm:$0xff] }
0x16ba   :  { %3694 = vmatprep.subr.bf16.mxu0 %v3971_v2  ;;  %v1561_v12 = vmul.f32 %v4400_v0, %v1556_v58 }
0x16bc   :  { %v1562_v18 = vadd.f32 %v1561_v12, %v4345_v32 }
0x178b   :  { %v1603_v4 = vpop.f32.mrb[52].mxu0 }
0x178c   :  { %v1604_v5 = vadd.f32 %v4073_v25, %v1603_v4  ;;  %v3670_v6 = vpop.f32.mrb[53].mxu0 }
0x178d   :  { %v1606_v7 = vpop.f32.mrb[54].mxu0 }
0x178e   :  { %3912 = vtanh.f32 %v1604_v5  ;;  %v3671_v8 = vpop.f32.mrb[55].mxu0 }
0x1798   :  { %v3913_v9 = vpop.eup %3912 }
0x1799   :  { %v1610_v11 = vpack.c.bf16 %v3913_v9, %v3913_v9 }
0x179b   :  { %3677 = vmatmul.mubr.msk.bf16.vlgmr.msra.gmra.mrb[52].mxu1 %vm185_vm3, %v1610_v11 }
0x179c   :  { %3687 = vmatpush3.bf16.msra.mxu1 %v4059_v23  ;;  %3690 = vmatprep.mubr.msk.bf16.mxu1 %vm3972_vm0, %v3971_v2 }
0x179d   :  { %3688 = vmatprep.subr.bf16.mxu1 %v3971_v2 }
0x17a0   :  { %3689 = vmatpush3.bf16.msra.mxu1 %v4066_v24 }
0x17a1   :  { %3700 = vmatprep.subr.bf16.mxu1 %v3971_v2 }
0x186e   :  { %v1648_v14 = vpop.f32.mrb[52].mxu1 }
0x186f   :  { %v1649_v15 = vadd.f32 %v4086_v33, %v1648_v14  ;;  %v3678_v16 = vpop.f32.mrb[53].mxu1 }
0x1870   :  { %v1651_v17 = vpop.f32.mrb[54].mxu1 }
0x1871   :  { %v1654_v19 = vmul.f32 %v3299_v13, %v1649_v15  ;;  %v1656_v20 = vmul.f32 %v3296_v56, %v1649_v15  ;;  %v3679_v21 = vpop.f32.mrb[55].mxu1 }
0x1873   :  { %v1655_v22 = vadd.f32 %v1654_v19, %v1562_v18  ;;  %v1657_v26 = vadd.f32 %v1656_v20, %v4345_v32  ;;  %v4483_v18 = vld [vmem:[%s4772_s4] sm:$0xff]   ;;  %v4492_v19 = vld [vmem:[%s4772_s4 + $0x8] sm:$0xff]  }
0x1874   :  { %v3308_v20 = vld [vmem:[%s4768_s0 + $0x80] sm:$0xff] }
0x1875   :  { %v1658_v27 = vpack.c.bf16 %v1657_v26, %v1657_v26 }
0x1877   :  { %3683 = vmatmul.mubr.msk.bf16.vlgmr.msra.gmra.mrb[56].mxu0 %vm127_vm1, %v1658_v27 }
0x1878   :  { %3695 = vmatpush3.bf16.msra.mxu0 %v4413_v1  ;;  %3696 = vmatprep.mubr.msk.bf16.mxu0 %vm3972_vm0, %v3971_v2 }
0x1879   :  { %3708 = vmatprep.subr.bf16.mxu0 %v3971_v2 }
0x194a   :  { %v1696_v28 = vpop.f32.mrb[56].mxu0 }
0x194b   :  { %v1697_v29 = vadd.f32 %v4073_v25, %v1696_v28  ;;  %v3684_v30 = vpop.f32.mrb[57].mxu0 }
0x194c   :  { %v1699_v31 = vpop.f32.mrb[58].mxu0 }
0x194d   :  { %3914 = vtanh.f32 %v1697_v29  ;;  %v3685_v3 = vpop.f32.mrb[59].mxu0 }
0x1957   :  { %v3915_v34 = vpop.eup %3914 }
0x1958   :  { %v1703_v35 = vpack.c.bf16 %v3915_v34, %v3915_v34 }
0x195a   :  { %3691 = vmatmul.mubr.msk.bf16.vlgmr.msra.gmra.mrb[56].mxu1 %vm185_vm3, %v1703_v35 }
0x195b   :  { %3701 = vmatpush3.bf16.msra.mxu1 %v4059_v23  ;;  %3704 = vmatprep.mubr.msk.bf16.mxu1 %vm3972_vm0, %v3971_v2 }
0x195c   :  { %3702 = vmatprep.subr.bf16.mxu1 %v3971_v2 }
0x195f   :  { %3703 = vmatpush3.bf16.msra.mxu1 %v4066_v24 }
0x1960   :  { %3714 = vmatprep.subr.bf16.mxu1 %v3971_v2 }
0x1a2d   :  { %v1741_v37 = vpop.f32.mrb[56].mxu1 }
0x1a2e   :  { %v1742_v39 = vadd.f32 %v4086_v33, %v1741_v37  ;;  %v3692_v40 = vpop.f32.mrb[57].mxu1 }
0x1a2f   :  { %v1744_v41 = vpop.f32.mrb[58].mxu1 }
0x1a30   :  { %v1747_v42 = vmul.f32 %v3299_v13, %v1742_v39  ;;  %v1749_v43 = vmul.f32 %v3297_v36, %v1742_v39  ;;  %v3693_v44 = vpop.f32.mrb[59].mxu1 }
0x1a31   :  { %v3311_v44 = vld [vmem:[%s4768_s0 + $0x98] sm:$0xff] }
0x1a32   :  { %v1748_v45 = vadd.f32 %v1747_v42, %v1655_v22  ;;  %v1750_v46 = vadd.f32 %v1749_v43, %v4345_v32  ;;  %v4502_v22 = vld [vmem:[%s4773_s5] ss:$0 sm:$0xff]  ;;  %v4522_v42 = vld [vmem:[%s4768_s0 + $0x90] sm:$0xff] }
0x1a34   :  { %v1751_v47 = vpack.c.bf16 %v1750_v46, %v1750_v46 }
0x1a36   :  { %3697 = vmatmul.mubr.msk.bf16.vlgmr.msra.gmra.mrb[60].mxu0 %vm127_vm1, %v1751_v47 }
0x1a37   :  { %3709 = vmatpush3.bf16.msra.mxu0 %v4413_v1  ;;  %3710 = vmatprep.mubr.msk.bf16.mxu0 %vm3972_vm0, %v3971_v2 }
0x1a38   :  { %3722 = vmatprep.subr.bf16.mxu0 %v3971_v2 }
0x1b09   :  { %v1789_v48 = vpop.f32.mrb[60].mxu0 }
0x1b0a   :  { %v1790_v49 = vadd.f32 %v4073_v25, %v1789_v48  ;;  %v3698_v50 = vpop.f32.mrb[61].mxu0 }
0x1b0b   :  { %v1792_v51 = vpop.f32.mrb[62].mxu0 }
0x1b0c   :  { %3916 = vtanh.f32 %v1790_v49  ;;  %v3699_v52 = vpop.f32.mrb[63].mxu0 }
0x1b16   :  { %v3917_v53 = vpop.eup %3916 }
0x1b17   :  { %v1796_v54 = vpack.c.bf16 %v3917_v53, %v3917_v53 }
0x1b19   :  { %3705 = vmatmul.mubr.msk.bf16.vlgmr.msra.gmra.mrb[60].mxu1 %vm185_vm3, %v1796_v54 }
0x1b1a   :  { %3715 = vmatpush3.bf16.msra.mxu1 %v4059_v23  ;;  %3718 = vmatprep.mubr.msk.bf16.mxu1 %vm3972_vm0, %v3971_v2 }
0x1b1b   :  { %3716 = vmatprep.subr.bf16.mxu1 %v3971_v2 }
0x1b1e   :  { %3717 = vmatpush3.bf16.msra.mxu1 %v4066_v24 }
0x1b1f   :  { %3728 = vmatprep.subr.bf16.mxu1 %v3971_v2 }
0x1bec   :  { %v1834_v25 = vpop.f32.mrb[60].mxu1 }
0x1bed   :  { %v1835_v32 = vadd.f32 %v4086_v33, %v1834_v25  ;;  %v3706_v55 = vpop.f32.mrb[61].mxu1 }
0x1bee   :  { %v1837_v56 = vpop.f32.mrb[62].mxu1 }
0x1bef   :  { %v1840_v57 = vmul.f32 %v4400_v0, %v1835_v32  ;;  %v3707_v58 = vpop.f32.mrb[63].mxu1  ;;  %v4476_v0 = vld [vmem:[%s4771_s3] ss:$0 sm:$0xff] }
0x1bf1   :  { %v4447_v38 = vadd.f32 %v1840_v57, %v1748_v45 }
0x1bf3   :  { %v1843_v23 = vcombine.high %v4447_v38, %v4447_v38  ;;  %v1850_v59 = vrot.slane %v4447_v38, %v4035_v10  ;;  %v1916_v24 = vpack.c.bf16 %v4447_v38, %v4447_v38 }
0x1bf5   :  { %v1857_v60 = vrot.slane %v1843_v23, %v4035_v10  ;;  %v1858_v61 = vcombine.high %v1850_v59, %v1850_v59  ;;  %v1866_v33 = vrot.slane %v1850_v59, %v4035_v10  ;;  %3711 = vmatmul.mubr.msk.bf16.vlgmr.msra.gmra.mrb[64].mxu0 %vm127_vm1, %v1916_v24  ;;  %v3309_v24 = vld [vmem:[%s4768_s0 + $0x88] sm:$0xff] }
0x1bf6   :  { %3723 = vmatpush3.bf16.msra.mxu0 %v4413_v1  ;;  %3724 = vmatprep.mubr.msk.bf16.mxu0 %vm3972_vm0, %v3971_v2 }
0x1bf7   :  { %v1859_v62 = vcombine.high %v1857_v60, %v1857_v60  ;;  %v1873_v63 = vrot.slane %v1857_v60, %v4035_v10  ;;  %v1880_v4 = vrot.slane %v1858_v61, %v4035_v10  ;;  %v1888_v5 = vcombine.high %v1866_v33, %v1866_v33  ;;  %1900 = vst.msk [vmem:[#allocation2 + $0x4] sm:$0x1] %vm104_vm2, %v1866_v33 }
0x1bf8   :  { %3736 = vmatprep.subr.bf16.mxu0 %v3971_v2 }
0x1bf9   :  { %v1887_v6 = vrot.slane %v1859_v62, %v4035_v10  ;;  %v1889_v7 = vcombine.high %v1873_v63, %v1873_v63  ;;  %v1890_v8 = vcombine.high %v1880_v4, %v1880_v4  ;;  %1901 = vst.msk [vmem:[#allocation2 + $0xc] sm:$0x1] %vm104_vm2, %v1880_v4  ;;  %1902 = vst.msk [vmem:[#allocation2 + $0x14] sm:$0x1] %vm104_vm2, %v1888_v5 }
0x1bfa   :  { %1904 = vst.msk [vmem:[#allocation2 + $0x24] sm:$0x1] %vm104_vm2, %v1873_v63 }
0x1bfb   :  { %v1891_v9 = vcombine.high %v1887_v6, %v1887_v6  ;;  %1903 = vst.msk [vmem:[#allocation2 + $0x1c] sm:$0x1] %vm104_vm2, %v1890_v8  ;;  %1905 = vst.msk [vmem:[#allocation2 + $0x2c] sm:$0x1] %vm104_vm2, %v1887_v6 }
0x1bfc   :  { %1906 = vst.msk [vmem:[#allocation2 + $0x34] sm:$0x1] %vm104_vm2, %v1889_v7 }
0x1bfd   :  { %1907 = vst.msk [vmem:[#allocation2 + $0x3c] sm:$0x1] %vm104_vm2, %v1891_v9 }
0x1cc8   :  { %v1954_v11 = vpop.f32.mrb[64].mxu0 }
0x1cc9   :  { %v1955_v12 = vadd.f32 %v4476_v0, %v1954_v11  ;;  %v3712_v13 = vpop.f32.mrb[65].mxu0 }
0x1cca   :  { %v1957_v14 = vpop.f32.mrb[66].mxu0 }
0x1ccb   :  { %3918 = vtanh.f32 %v1955_v12  ;;  %v3713_v15 = vpop.f32.mrb[67].mxu0 }
0x1cd5   :  { %v3919_v16 = vpop.eup %3918 }
0x1cd6   :  { %v1961_v17 = vpack.c.bf16 %v3919_v16, %v3919_v16 }
0x1cd8   :  { %3719 = vmatmul.mubr.msk.bf16.vlgmr.msra.gmra.mrb[64].mxu1 %vm185_vm3, %v1961_v17 }
0x1cd9   :  { %3729 = vmatpush3.bf16.msra.mxu1 %v4483_v18  ;;  %3732 = vmatprep.mubr.msk.bf16.mxu1 %vm3972_vm0, %v3971_v2 }
0x1cda   :  { %3730 = vmatprep.subr.bf16.mxu1 %v3971_v2 }
0x1cdd   :  { %3731 = vmatpush3.bf16.msra.mxu1 %v4492_v19 }
0x1cde   :  { %3742 = vmatprep.subr.bf16.mxu1 %v3971_v2 }
0x1dab   :  { %v1999_v21 = vpop.f32.mrb[64].mxu1 }
0x1dac   :  { %v2000_v26 = vadd.f32 %v4502_v22, %v1999_v21  ;;  %v3720_v27 = vpop.f32.mrb[65].mxu1 }
0x1dad   :  { %v2002_v28 = vpop.f32.mrb[66].mxu1 }
0x1dae   :  { %v2007_v29 = vmul.f32 %v3308_v20, %v2000_v26  ;;  %v3721_v30 = vpop.f32.mrb[67].mxu1  ;;  %v2005_v43 = vmul.f32 %v4522_v42, %v2000_v26 }
0x1db0   :  { %v2008_v31 = vadd.f32 %v2007_v29, %v4447_v38  ;;  %v2006_v49 = vadd.f32 %v2005_v43, %v4447_v38 }
0x1db2   :  { %v2009_v3 = vpack.c.bf16 %v2008_v31, %v2008_v31 }
0x1db4   :  { %3725 = vmatmul.mubr.msk.bf16.vlgmr.msra.gmra.mrb[68].mxu0 %vm127_vm1, %v2009_v3 }
0x1db5   :  { %3737 = vmatpush3.bf16.msra.mxu0 %v4413_v1  ;;  %3738 = vmatprep.mubr.msk.bf16.mxu0 %vm3972_vm0, %v3971_v2 }
0x1db6   :  { %3750 = vmatprep.subr.bf16.mxu0 %v3971_v2 }
0x1e87   :  { %v2047_v34 = vpop.f32.mrb[68].mxu0 }
0x1e88   :  { %v2048_v35 = vadd.f32 %v4476_v0, %v2047_v34  ;;  %v3726_v36 = vpop.f32.mrb[69].mxu0 }
0x1e89   :  { %v2050_v37 = vpop.f32.mrb[70].mxu0 }
0x1e8a   :  { %3920 = vtanh.f32 %v2048_v35  ;;  %v3727_v39 = vpop.f32.mrb[71].mxu0 }
0x1e94   :  { %v3921_v40 = vpop.eup %3920 }
0x1e95   :  { %v2054_v41 = vpack.c.bf16 %v3921_v40, %v3921_v40 }
0x1e97   :  { %3733 = vmatmul.mubr.msk.bf16.vlgmr.msra.gmra.mrb[68].mxu1 %vm185_vm3, %v2054_v41 }
0x1e98   :  { %3743 = vmatpush3.bf16.msra.mxu1 %v4483_v18  ;;  %3746 = vmatprep.mubr.msk.bf16.mxu1 %vm3972_vm0, %v3971_v2 }
0x1e99   :  { %3744 = vmatprep.subr.bf16.mxu1 %v3971_v2 }
0x1e9c   :  { %3745 = vmatpush3.bf16.msra.mxu1 %v4492_v19 }
0x1e9d   :  { %3756 = vmatprep.subr.bf16.mxu1 %v3971_v2 }
0x1f6a   :  { %v2092_v45 = vpop.f32.mrb[68].mxu1 }
0x1f6b   :  { %v2093_v46 = vadd.f32 %v4502_v22, %v2092_v45  ;;  %v3734_v47 = vpop.f32.mrb[69].mxu1 }
0x1f6c   :  { %v2095_v48 = vpop.f32.mrb[70].mxu1 }
0x1f6d   :  { %v2098_v50 = vmul.f32 %v3311_v44, %v2093_v46  ;;  %v2100_v51 = vmul.f32 %v3308_v20, %v2093_v46  ;;  %v3735_v52 = vpop.f32.mrb[71].mxu1 }
0x1f6e   :  { %v3320_v52 = vld [vmem:[%s4768_s0 + $0xa0] sm:$0xff] }
0x1f6f   :  { %v2099_v53 = vadd.f32 %v2098_v50, %v2006_v49  ;;  %v2101_v54 = vadd.f32 %v2100_v51, %v4447_v38 }
0x1f71   :  { %v2102_v25 = vpack.c.bf16 %v2101_v54, %v2101_v54 }
0x1f73   :  { %3739 = vmatmul.mubr.msk.bf16.vlgmr.msra.gmra.mrb[72].mxu0 %vm127_vm1, %v2102_v25 }
0x1f74   :  { %3751 = vmatpush3.bf16.msra.mxu0 %v4413_v1  ;;  %3752 = vmatprep.mubr.msk.bf16.mxu0 %vm3972_vm0, %v3971_v2 }
0x1f75   :  { %3764 = vmatprep.subr.bf16.mxu0 %v3971_v2 }
0x2046   :  { %v2140_v32 = vpop.f32.mrb[72].mxu0 }
0x2047   :  { %v2141_v55 = vadd.f32 %v4476_v0, %v2140_v32  ;;  %v3740_v56 = vpop.f32.mrb[73].mxu0 }
0x2048   :  { %v2143_v57 = vpop.f32.mrb[74].mxu0 }
0x2049   :  { %3922 = vtanh.f32 %v2141_v55  ;;  %v3741_v58 = vpop.f32.mrb[75].mxu0 }
0x2053   :  { %v3923_v23 = vpop.eup %3922 }
0x2054   :  { %v2147_v59 = vpack.c.bf16 %v3923_v23, %v3923_v23 }
0x2056   :  { %3747 = vmatmul.mubr.msk.bf16.vlgmr.msra.gmra.mrb[72].mxu1 %vm185_vm3, %v2147_v59 }
0x2057   :  { %3757 = vmatpush3.bf16.msra.mxu1 %v4483_v18  ;;  %3760 = vmatprep.mubr.msk.bf16.mxu1 %vm3972_vm0, %v3971_v2 }
0x2058   :  { %3758 = vmatprep.subr.bf16.mxu1 %v3971_v2 }
0x205b   :  { %3759 = vmatpush3.bf16.msra.mxu1 %v4492_v19 }
0x205c   :  { %3770 = vmatprep.subr.bf16.mxu1 %v3971_v2 }
0x2129   :  { %v2185_v60 = vpop.f32.mrb[72].mxu1 }
0x212a   :  { %v2186_v61 = vadd.f32 %v4502_v22, %v2185_v60  ;;  %v3748_v33 = vpop.f32.mrb[73].mxu1 }
0x212b   :  { %v2188_v62 = vpop.f32.mrb[74].mxu1 }
0x212c   :  { %v2191_v63 = vmul.f32 %v3311_v44, %v2186_v61  ;;  %v2193_v4 = vmul.f32 %v3309_v24, %v2186_v61  ;;  %v3749_v5 = vpop.f32.mrb[75].mxu1 }
0x212d   :  { %v3323_v5 = vld [vmem:[%s4768_s0 + $0xb8] sm:$0xff] }
0x212e   :  { %v2192_v6 = vadd.f32 %v2191_v63, %v2099_v53  ;;  %v2194_v7 = vadd.f32 %v2193_v4, %v4447_v38  ;;  %v4619_v63 = vld [vmem:[%s4768_s0 + $0xb0] sm:$0xff] }
0x2130   :  { %v2195_v8 = vpack.c.bf16 %v2194_v7, %v2194_v7 }
0x2132   :  { %3753 = vmatmul.mubr.msk.bf16.vlgmr.msra.gmra.mrb[76].mxu0 %vm127_vm1, %v2195_v8 }
0x2133   :  { %3765 = vmatpush3.bf16.msra.mxu0 %v4413_v1  ;;  %3766 = vmatprep.mubr.msk.bf16.mxu0 %vm3972_vm0, %v3971_v2 }
0x2134   :  { %3778 = vmatprep.subr.bf16.mxu0 %v3971_v2 }
0x2205   :  { %v2233_v9 = vpop.f32.mrb[76].mxu0 }
0x2206   :  { %v2234_v11 = vadd.f32 %v4476_v0, %v2233_v9  ;;  %v3754_v12 = vpop.f32.mrb[77].mxu0 }
0x2207   :  { %v2236_v13 = vpop.f32.mrb[78].mxu0 }
0x2208   :  { %3924 = vtanh.f32 %v2234_v11  ;;  %v3755_v14 = vpop.f32.mrb[79].mxu0 }
0x2212   :  { %v3925_v15 = vpop.eup %3924 }
0x2213   :  { %v2240_v16 = vpack.c.bf16 %v3925_v15, %v3925_v15 }
0x2215   :  { %3761 = vmatmul.mubr.msk.bf16.vlgmr.msra.gmra.mrb[76].mxu1 %vm185_vm3, %v2240_v16 }
0x2216   :  { %3771 = vmatpush3.bf16.msra.mxu1 %v4483_v18  ;;  %3774 = vmatprep.mubr.msk.bf16.mxu1 %vm3972_vm0, %v3971_v2 }
0x2217   :  { %3772 = vmatprep.subr.bf16.mxu1 %v3971_v2 }
0x221a   :  { %3773 = vmatpush3.bf16.msra.mxu1 %v4492_v19 }
0x221b   :  { %3784 = vmatprep.subr.bf16.mxu1 %v3971_v2 }
0x22e8   :  { %v2278_v38 = vpop.f32.mrb[76].mxu1 }
0x22e9   :  { %v2279_v17 = vadd.f32 %v4502_v22, %v2278_v38  ;;  %v3762_v20 = vpop.f32.mrb[77].mxu1 }
0x22ea   :  { %v2281_v21 = vpop.f32.mrb[78].mxu1 }
0x22eb   :  { %v2284_v26 = vmul.f32 %v4522_v42, %v2279_v17  ;;  %v3763_v27 = vpop.f32.mrb[79].mxu1 }
0x22ed   :  { %v4564_v28 = vadd.f32 %v2284_v26, %v2192_v6 }
0x22ef   :  { %v2287_v29 = vcombine.high %v4564_v28, %v4564_v28  ;;  %v2294_v30 = vrot.slane %v4564_v28, %v4035_v10  ;;  %v2360_v31 = vpack.c.bf16 %v4564_v28, %v4564_v28 }
0x22f1   :  { %v2301_v3 = vrot.slane %v2287_v29, %v4035_v10  ;;  %v2302_v34 = vcombine.high %v2294_v30, %v2294_v30  ;;  %v2310_v35 = vrot.slane %v2294_v30, %v4035_v10  ;;  %3767 = vmatmul.mubr.msk.bf16.vlgmr.msra.gmra.mrb[80].mxu0 %vm127_vm1, %v2360_v31  ;;  %v3321_v31 = vld [vmem:[%s4768_s0 + $0xa8] sm:$0xff] }
0x22f2   :  { %3779 = vmatpush3.bf16.msra.mxu0 %v4413_v1  ;;  %3780 = vmatprep.mubr.msk.bf16.mxu0 %vm3972_vm0, %v3971_v2 }
0x22f3   :  { %v2303_v36 = vcombine.high %v2301_v3, %v2301_v3  ;;  %v2317_v37 = vrot.slane %v2301_v3, %v4035_v10  ;;  %v2324_v39 = vrot.slane %v2302_v34, %v4035_v10  ;;  %v2332_v40 = vcombine.high %v2310_v35, %v2310_v35  ;;  %2344 = vst.msk [vmem:[#allocation2 + $0x5] sm:$0x1] %vm104_vm2, %v2310_v35 }
0x22f4   :  { %3792 = vmatprep.subr.bf16.mxu0 %v3971_v2 }
0x22f5   :  { %v2331_v41 = vrot.slane %v2303_v36, %v4035_v10  ;;  %v2333_v42 = vcombine.high %v2317_v37, %v2317_v37  ;;  %v2334_v43 = vcombine.high %v2324_v39, %v2324_v39  ;;  %2345 = vst.msk [vmem:[#allocation2 + $0xd] sm:$0x1] %vm104_vm2, %v2324_v39  ;;  %2346 = vst.msk [vmem:[#allocation2 + $0x15] sm:$0x1] %vm104_vm2, %v2332_v40 }
0x22f6   :  { %2348 = vst.msk [vmem:[#allocation2 + $0x25] sm:$0x1] %vm104_vm2, %v2317_v37 }
0x22f7   :  { %v2335_v44 = vcombine.high %v2331_v41, %v2331_v41  ;;  %2347 = vst.msk [vmem:[#allocation2 + $0x1d] sm:$0x1] %vm104_vm2, %v2334_v43  ;;  %2349 = vst.msk [vmem:[#allocation2 + $0x2d] sm:$0x1] %vm104_vm2, %v2331_v41 }
0x22f8   :  { %2350 = vst.msk [vmem:[#allocation2 + $0x35] sm:$0x1] %vm104_vm2, %v2333_v42 }
0x22f9   :  { %2351 = vst.msk [vmem:[#allocation2 + $0x3d] sm:$0x1] %vm104_vm2, %v2335_v44 }
0x23c4   :  { %v2398_v45 = vpop.f32.mrb[80].mxu0 }
0x23c5   :  { %v2399_v46 = vadd.f32 %v4476_v0, %v2398_v45  ;;  %v3768_v47 = vpop.f32.mrb[81].mxu0 }
0x23c6   :  { %v2401_v48 = vpop.f32.mrb[82].mxu0 }
0x23c7   :  { %3926 = vtanh.f32 %v2399_v46  ;;  %v3769_v49 = vpop.f32.mrb[83].mxu0 }
0x23d1   :  { %v3927_v50 = vpop.eup %3926 }
0x23d2   :  { %v2405_v51 = vpack.c.bf16 %v3927_v50, %v3927_v50 }
0x23d4   :  { %3775 = vmatmul.mubr.msk.bf16.vlgmr.msra.gmra.mrb[80].mxu1 %vm185_vm3, %v2405_v51 }
0x23d5   :  { %3785 = vmatpush3.bf16.msra.mxu1 %v4483_v18  ;;  %3788 = vmatprep.mubr.msk.bf16.mxu1 %vm3972_vm0, %v3971_v2 }
0x23d6   :  { %3786 = vmatprep.subr.bf16.mxu1 %v3971_v2 }
0x23d9   :  { %3787 = vmatpush3.bf16.msra.mxu1 %v4492_v19 }
0x23da   :  { %3798 = vmatprep.subr.bf16.mxu1 %v3971_v2 }
0x24a7   :  { %v2443_v53 = vpop.f32.mrb[80].mxu1 }
0x24a8   :  { %v2444_v54 = vadd.f32 %v4502_v22, %v2443_v53  ;;  %v3776_v25 = vpop.f32.mrb[81].mxu1 }
0x24a9   :  { %v2446_v32 = vpop.f32.mrb[82].mxu1 }
0x24aa   :  { %v2451_v55 = vmul.f32 %v3320_v52, %v2444_v54  ;;  %v3777_v56 = vpop.f32.mrb[83].mxu1  ;;  %v2449_v4 = vmul.f32 %v4619_v63, %v2444_v54 }
0x24ac   :  { %v2452_v57 = vadd.f32 %v2451_v55, %v4564_v28  ;;  %v2450_v11 = vadd.f32 %v2449_v4, %v4564_v28 }
0x24ae   :  { %v2453_v58 = vpack.c.bf16 %v2452_v57, %v2452_v57 }
0x24b0   :  { %3781 = vmatmul.mubr.msk.bf16.vlgmr.msra.gmra.mrb[84].mxu0 %vm127_vm1, %v2453_v58 }
0x24b1   :  { %3793 = vmatpush3.bf16.msra.mxu0 %v4413_v1  ;;  %3794 = vmatprep.mubr.msk.bf16.mxu0 %vm3972_vm0, %v3971_v2 }
0x24b2   :  { %3806 = vmatprep.subr.bf16.mxu0 %v3971_v2 }
0x2583   :  { %v2491_v23 = vpop.f32.mrb[84].mxu0 }
0x2584   :  { %v2492_v59 = vadd.f32 %v4476_v0, %v2491_v23  ;;  %v3782_v24 = vpop.f32.mrb[85].mxu0 }
0x2585   :  { %v2494_v60 = vpop.f32.mrb[86].mxu0 }
0x2586   :  { %3928 = vtanh.f32 %v2492_v59  ;;  %v3783_v61 = vpop.f32.mrb[87].mxu0 }
0x2590   :  { %v3929_v33 = vpop.eup %3928 }
0x2591   :  { %v2498_v62 = vpack.c.bf16 %v3929_v33, %v3929_v33 }
0x2593   :  { %3789 = vmatmul.mubr.msk.bf16.vlgmr.msra.gmra.mrb[84].mxu1 %vm185_vm3, %v2498_v62 }
0x2594   :  { %3799 = vmatpush3.bf16.msra.mxu1 %v4483_v18  ;;  %3802 = vmatprep.mubr.msk.bf16.mxu1 %vm3972_vm0, %v3971_v2 }
0x2595   :  { %3800 = vmatprep.subr.bf16.mxu1 %v3971_v2 }
0x2598   :  { %3801 = vmatpush3.bf16.msra.mxu1 %v4492_v19 }
0x2599   :  { %3812 = vmatprep.subr.bf16.mxu1 %v3971_v2 }
0x2666   :  { %v2536_v6 = vpop.f32.mrb[84].mxu1 }
0x2667   :  { %v2537_v7 = vadd.f32 %v4502_v22, %v2536_v6  ;;  %v3790_v8 = vpop.f32.mrb[85].mxu1 }
0x2668   :  { %v2539_v9 = vpop.f32.mrb[86].mxu1 }
0x2669   :  { %v2542_v12 = vmul.f32 %v3323_v5, %v2537_v7  ;;  %v2544_v13 = vmul.f32 %v3320_v52, %v2537_v7  ;;  %v3791_v14 = vpop.f32.mrb[87].mxu1 }
0x266a   :  { %v3332_v14 = vld [vmem:[%s4768_s0 + $0xc0] sm:$0xff] }
0x266b   :  { %v2543_v15 = vadd.f32 %v2542_v12, %v2450_v11  ;;  %v2545_v16 = vadd.f32 %v2544_v13, %v4564_v28 }
0x266d   :  { %v2546_v38 = vpack.c.bf16 %v2545_v16, %v2545_v16 }
0x266f   :  { %3795 = vmatmul.mubr.msk.bf16.vlgmr.msra.gmra.mrb[88].mxu0 %vm127_vm1, %v2546_v38 }
0x2670   :  { %3807 = vmatpush3.bf16.msra.mxu0 %v4413_v1  ;;  %3808 = vmatprep.mubr.msk.bf16.mxu0 %vm3972_vm0, %v3971_v2 }
0x2671   :  { %3820 = vmatprep.subr.bf16.mxu0 %v3971_v2 }
0x2742   :  { %v2584_v17 = vpop.f32.mrb[88].mxu0 }
0x2743   :  { %v2585_v20 = vadd.f32 %v4476_v0, %v2584_v17  ;;  %v3796_v21 = vpop.f32.mrb[89].mxu0 }
0x2744   :  { %v2587_v26 = vpop.f32.mrb[90].mxu0 }
0x2745   :  { %3930 = vtanh.f32 %v2585_v20  ;;  %v3797_v27 = vpop.f32.mrb[91].mxu0 }
0x274f   :  { %v3931_v29 = vpop.eup %3930 }
0x2750   :  { %v2591_v30 = vpack.c.bf16 %v3931_v29, %v3931_v29 }
0x2752   :  { %3803 = vmatmul.mubr.msk.bf16.vlgmr.msra.gmra.mrb[88].mxu1 %vm185_vm3, %v2591_v30 }
0x2753   :  { %3813 = vmatpush3.bf16.msra.mxu1 %v4483_v18  ;;  %3816 = vmatprep.mubr.msk.bf16.mxu1 %vm3972_vm0, %v3971_v2 }
0x2754   :  { %3814 = vmatprep.subr.bf16.mxu1 %v3971_v2 }
0x2757   :  { %3815 = vmatpush3.bf16.msra.mxu1 %v4492_v19 }
0x2758   :  { %3826 = vmatprep.subr.bf16.mxu1 %v3971_v2 }
0x2825   :  { %v2629_v3 = vpop.f32.mrb[88].mxu1 }
0x2826   :  { %v2630_v34 = vadd.f32 %v4502_v22, %v2629_v3  ;;  %v3804_v35 = vpop.f32.mrb[89].mxu1 }
0x2827   :  { %v2632_v36 = vpop.f32.mrb[90].mxu1 }
0x2828   :  { %v2635_v37 = vmul.f32 %v3323_v5, %v2630_v34  ;;  %v2637_v39 = vmul.f32 %v3321_v31, %v2630_v34  ;;  %v3805_v40 = vpop.f32.mrb[91].mxu1 }
0x2829   :  { %v3335_v40 = vld [vmem:[%s4768_s0 + $0xd8] sm:$0xff] }
0x282a   :  { %v2636_v41 = vadd.f32 %v2635_v37, %v2543_v15  ;;  %v2638_v42 = vadd.f32 %v2637_v39, %v4564_v28  ;;  %v3334_v37 = vld [vmem:[%s4768_s0 + $0xd0] sm:$0xff] }
0x282c   :  { %v2639_v43 = vpack.c.bf16 %v2638_v42, %v2638_v42 }
0x282e   :  { %3809 = vmatmul.mubr.msk.bf16.vlgmr.msra.gmra.mrb[92].mxu0 %vm127_vm1, %v2639_v43 }
0x282f   :  { %3821 = vmatpush3.bf16.msra.mxu0 %v4413_v1  ;;  %3822 = vmatprep.mubr.msk.bf16.mxu0 %vm3972_vm0, %v3971_v2 }
0x2830   :  { %3834 = vmatprep.subr.bf16.mxu0 %v3971_v2 }
0x2901   :  { %v2677_v44 = vpop.f32.mrb[92].mxu0 }
0x2902   :  { %v2678_v45 = vadd.f32 %v4476_v0, %v2677_v44  ;;  %v3810_v46 = vpop.f32.mrb[93].mxu0 }
0x2903   :  { %v2680_v47 = vpop.f32.mrb[94].mxu0 }
0x2904   :  { %3932 = vtanh.f32 %v2678_v45  ;;  %v3811_v48 = vpop.f32.mrb[95].mxu0 }
0x290e   :  { %v3933_v49 = vpop.eup %3932 }
0x290f   :  { %v2684_v50 = vpack.c.bf16 %v3933_v49, %v3933_v49 }
0x2911   :  { %3817 = vmatmul.mubr.msk.bf16.vlgmr.msra.gmra.mrb[92].mxu1 %vm185_vm3, %v2684_v50 }
0x2912   :  { %3827 = vmatpush3.bf16.msra.mxu1 %v4483_v18  ;;  %3830 = vmatprep.mubr.msk.bf16.mxu1 %vm3972_vm0, %v3971_v2 }
0x2913   :  { %3828 = vmatprep.subr.bf16.mxu1 %v3971_v2 }
0x2916   :  { %3829 = vmatpush3.bf16.msra.mxu1 %v4492_v19 }
0x2917   :  { %3840 = vmatprep.subr.bf16.mxu1 %v3971_v2 }
0x29e4   :  { %v2722_v28 = vpop.f32.mrb[92].mxu1 }
0x29e5   :  { %v2723_v51 = vadd.f32 %v4502_v22, %v2722_v28  ;;  %v3818_v52 = vpop.f32.mrb[93].mxu1 }
0x29e6   :  { %v2725_v53 = vpop.f32.mrb[94].mxu1 }
0x29e7   :  { %v2728_v54 = vmul.f32 %v4619_v63, %v2723_v51  ;;  %v3819_v25 = vpop.f32.mrb[95].mxu1 }
0x29e9   :  { %v4661_v32 = vadd.f32 %v2728_v54, %v2636_v41 }
0x29eb   :  { %v2731_v55 = vcombine.high %v4661_v32, %v4661_v32  ;;  %v2738_v56 = vrot.slane %v4661_v32, %v4035_v10  ;;  %v2804_v57 = vpack.c.bf16 %v4661_v32, %v4661_v32 }
0x29ed   :  { %v2745_v58 = vrot.slane %v2731_v55, %v4035_v10  ;;  %v2746_v23 = vcombine.high %v2738_v56, %v2738_v56  ;;  %v2754_v59 = vrot.slane %v2738_v56, %v4035_v10  ;;  %3823 = vmatmul.mubr.msk.bf16.vlgmr.msra.gmra.mrb[96].mxu0 %vm127_vm1, %v2804_v57 }
0x29ee   :  { %3835 = vmatpush3.bf16.msra.mxu0 %v4413_v1  ;;  %3836 = vmatprep.mubr.msk.bf16.mxu0 %vm3972_vm0, %v3971_v2 }
0x29ef   :  { %v2747_v24 = vcombine.high %v2745_v58, %v2745_v58  ;;  %v2761_v60 = vrot.slane %v2745_v58, %v4035_v10  ;;  %v2768_v61 = vrot.slane %v2746_v23, %v4035_v10  ;;  %v2776_v33 = vcombine.high %v2754_v59, %v2754_v59  ;;  %2788 = vst.msk [vmem:[#allocation2 + $0x6] sm:$0x1] %vm104_vm2, %v2754_v59 }
0x29f0   :  { %3848 = vmatprep.subr.bf16.mxu0 %v3971_v2 }
0x29f1   :  { %v2775_v62 = vrot.slane %v2747_v24, %v4035_v10  ;;  %v2777_v63 = vcombine.high %v2761_v60, %v2761_v60  ;;  %v2778_v4 = vcombine.high %v2768_v61, %v2768_v61  ;;  %2789 = vst.msk [vmem:[#allocation2 + $0xe] sm:$0x1] %vm104_vm2, %v2768_v61  ;;  %2790 = vst.msk [vmem:[#allocation2 + $0x16] sm:$0x1] %vm104_vm2, %v2776_v33 }
0x29f2   :  { %2792 = vst.msk [vmem:[#allocation2 + $0x26] sm:$0x1] %vm104_vm2, %v2761_v60 }
0x29f3   :  { %v2779_v5 = vcombine.high %v2775_v62, %v2775_v62  ;;  %2791 = vst.msk [vmem:[#allocation2 + $0x1e] sm:$0x1] %vm104_vm2, %v2778_v4  ;;  %2793 = vst.msk [vmem:[#allocation2 + $0x2e] sm:$0x1] %vm104_vm2, %v2775_v62 }
0x29f4   :  { %2794 = vst.msk [vmem:[#allocation2 + $0x36] sm:$0x1] %vm104_vm2, %v2777_v63 }
0x29f5   :  { %2795 = vst.msk [vmem:[#allocation2 + $0x3e] sm:$0x1] %vm104_vm2, %v2779_v5 }
0x2ac0   :  { %v2842_v6 = vpop.f32.mrb[96].mxu0 }
0x2ac1   :  { %v2843_v7 = vadd.f32 %v4476_v0, %v2842_v6  ;;  %v3824_v8 = vpop.f32.mrb[97].mxu0 }
0x2ac2   :  { %v2845_v9 = vpop.f32.mrb[98].mxu0 }
0x2ac3   :  { %3934 = vtanh.f32 %v2843_v7  ;;  %v3825_v11 = vpop.f32.mrb[99].mxu0 }
0x2acd   :  { %v3935_v12 = vpop.eup %3934 }
0x2ace   :  { %v2849_v13 = vpack.c.bf16 %v3935_v12, %v3935_v12 }
0x2ad0   :  { %3831 = vmatmul.mubr.msk.bf16.vlgmr.msra.gmra.mrb[96].mxu1 %vm185_vm3, %v2849_v13 }
0x2ad1   :  { %3841 = vmatpush3.bf16.msra.mxu1 %v4483_v18  ;;  %3844 = vmatprep.mubr.msk.bf16.mxu1 %vm3972_vm0, %v3971_v2 }
0x2ad2   :  { %3842 = vmatprep.subr.bf16.mxu1 %v3971_v2 }
0x2ad5   :  { %3843 = vmatpush3.bf16.msra.mxu1 %v4492_v19 }
0x2ad6   :  { %3854 = vmatprep.subr.bf16.mxu1 %v3971_v2 }
0x2ba3   :  { %v2887_v15 = vpop.f32.mrb[96].mxu1 }
0x2ba4   :  { %v2888_v16 = vadd.f32 %v4502_v22, %v2887_v15  ;;  %v3832_v38 = vpop.f32.mrb[97].mxu1 }
0x2ba5   :  { %v2890_v17 = vpop.f32.mrb[98].mxu1 }
0x2ba6   :  { %v2895_v20 = vmul.f32 %v3332_v14, %v2888_v16  ;;  %v3833_v21 = vpop.f32.mrb[99].mxu1  ;;  %v2893_v39 = vmul.f32 %v3334_v37, %v2888_v16 }
0x2ba8   :  { %v2896_v26 = vadd.f32 %v2895_v20, %v4661_v32  ;;  %v2894_v45 = vadd.f32 %v2893_v39, %v4661_v32 }
0x2baa   :  { %v2897_v27 = vpack.c.bf16 %v2896_v26, %v2896_v26 }
0x2bac   :  { %3837 = vmatmul.mubr.msk.bf16.vlgmr.msra.gmra.mrb[100].mxu0 %vm127_vm1, %v2897_v27 }
0x2bad   :  { %3849 = vmatpush3.bf16.msra.mxu0 %v4413_v1  ;;  %3850 = vmatprep.mubr.msk.bf16.mxu0 %vm3972_vm0, %v3971_v2 }
0x2bae   :  { %3862 = vmatprep.subr.bf16.mxu0 %v3971_v2 }
0x2c7f   :  { %v2935_v29 = vpop.f32.mrb[100].mxu0 }
0x2c80   :  { %v2936_v30 = vadd.f32 %v4476_v0, %v2935_v29  ;;  %v3838_v31 = vpop.f32.mrb[101].mxu0 }
0x2c81   :  { %v2938_v3 = vpop.f32.mrb[102].mxu0 }
0x2c82   :  { %3936 = vtanh.f32 %v2936_v30  ;;  %v3839_v34 = vpop.f32.mrb[103].mxu0 }
0x2c8c   :  { %v3937_v35 = vpop.eup %3936 }
0x2c8d   :  { %v2942_v36 = vpack.c.bf16 %v3937_v35, %v3937_v35 }
0x2c8f   :  { %3845 = vmatmul.mubr.msk.bf16.vlgmr.msra.gmra.mrb[100].mxu1 %vm185_vm3, %v2942_v36 }
0x2c90   :  { %3855 = vmatpush3.bf16.msra.mxu1 %v4483_v18  ;;  %3858 = vmatprep.mubr.msk.bf16.mxu1 %vm3972_vm0, %v3971_v2 }
0x2c91   :  { %3856 = vmatprep.subr.bf16.mxu1 %v3971_v2 }
0x2c94   :  { %3857 = vmatpush3.bf16.msra.mxu1 %v4492_v19 }
0x2c95   :  { %3868 = vmatprep.subr.bf16.mxu1 %v3971_v2 }
0x2d62   :  { %v2980_v41 = vpop.f32.mrb[100].mxu1 }
0x2d63   :  { %v2981_v42 = vadd.f32 %v4502_v22, %v2980_v41  ;;  %v3846_v43 = vpop.f32.mrb[101].mxu1 }
0x2d64   :  { %v2983_v44 = vpop.f32.mrb[102].mxu1 }
0x2d65   :  { %v2986_v46 = vmul.f32 %v3335_v40, %v2981_v42  ;;  %v2988_v47 = vmul.f32 %v3332_v14, %v2981_v42  ;;  %v3847_v48 = vpop.f32.mrb[103].mxu1 }
0x2d67   :  { %v2987_v49 = vadd.f32 %v2986_v46, %v2894_v45  ;;  %v2989_v50 = vadd.f32 %v2988_v47, %v4661_v32 }
0x2d69   :  { %v2990_v28 = vpack.c.bf16 %v2989_v50, %v2989_v50 }
0x2d6b   :  { %3851 = vmatmul.mubr.msk.bf16.vlgmr.msra.gmra.mrb[104].mxu0 %vm127_vm1, %v2990_v28 }
0x2d6c   :  { %3863 = vmatpush3.bf16.msra.mxu0 %v4413_v1  ;;  %3864 = vmatprep.mubr.msk.bf16.mxu0 %vm3972_vm0, %v3971_v2  ;;  %v3333_v1 = vld [vmem:[%s4768_s0 + $0xc8] sm:$0xff]  ;;  %s3974_s0 = smov [#allocation2]  }
0x2d6d   :  { %s3245_s19 = sshll.u32 %s3974_s0, 4  ;;  %s3246_s19 = int_to_ptr.vmem [resolvable:$true] %s3245_s19 }
0x2d6e   :  { %s3947_s3 = scalar_lea.vmem %s3246_s19, 1024  ;;  %p3952_p1 = scmp.lt.s32.totalorder %s3246_s19, %s3246_s19 }
0x2d6f   :  { %p3948_p0 = scmp.ne.s32.totalorder %s3246_s19, %s3947_s3  ;;  %p3953_p2 = scmp.lt.s32.totalorder %s3947_s3, %s3947_s3 }
0x2d71   :  { %p3954_p3 = por %p3953_p2, %p3952_p1 }
0x2d73   :  { %p3955_p4 = pnand %p3954_p3, %p3948_p0 }
0x2e3e   :  { %v3028_v51 = vpop.f32.mrb[104].mxu0 }
0x2e3f   :  { %v3029_v52 = vadd.f32 %v4476_v0, %v3028_v51  ;;  %v3852_v53 = vpop.f32.mrb[105].mxu0 }
0x2e40   :  { %v3031_v54 = vpop.f32.mrb[106].mxu0 }
0x2e41   :  { %3938 = vtanh.f32 %v3029_v52  ;;  %v3853_v25 = vpop.f32.mrb[107].mxu0 }
0x2e4b   :  { %v3939_v55 = vpop.eup %3938 }
0x2e4c   :  { %v3035_v56 = vpack.c.bf16 %v3939_v55, %v3939_v55 }
0x2e4e   :  { %3859 = vmatmul.mubr.msk.bf16.vlgmr.msra.gmra.mrb[104].mxu1 %vm185_vm3, %v3035_v56 }
0x2e4f   :  { %3869 = vmatpush3.bf16.msra.mxu1 %v4483_v18  ;;  %3872 = vmatprep.mubr.msk.bf16.mxu1 %vm3972_vm0, %v3971_v2 }
0x2e50   :  { %3870 = vmatprep.subr.bf16.mxu1 %v3971_v2 }
0x2e53   :  { %3871 = vmatpush3.bf16.msra.mxu1 %v4492_v19 }
0x2f21   :  { %v3073_v57 = vpop.f32.mrb[104].mxu1 }
0x2f22   :  { %v3074_v58 = vadd.f32 %v4502_v22, %v3073_v57  ;;  %v3860_v23 = vpop.f32.mrb[105].mxu1 }
0x2f23   :  { %v3076_v59 = vpop.f32.mrb[106].mxu1 }
0x2f24   :  { %v3079_v24 = vmul.f32 %v3335_v40, %v3074_v58  ;;  %v3081_v60 = vmul.f32 %v3333_v1, %v3074_v58  ;;  %v3861_v61 = vpop.f32.mrb[107].mxu1 }
0x2f26   :  { %v3080_v18 = vadd.f32 %v3079_v24, %v2987_v49  ;;  %v3082_v33 = vadd.f32 %v3081_v60, %v4661_v32 }
0x2f28   :  { %v3083_v62 = vpack.c.bf16 %v3082_v33, %v3082_v33 }
0x2f2a   :  { %3865 = vmatmul.mubr.msk.bf16.vlgmr.msra.gmra.mrb[108].mxu0 %vm127_vm1, %v3083_v62 }
0x2ffd   :  { %v3121_v2 = vpop.f32.mrb[108].mxu0 }
0x2ffe   :  { %v3122_v19 = vadd.f32 %v4476_v0, %v3121_v2  ;;  %v3866_v63 = vpop.f32.mrb[109].mxu0 }
0x2fff   :  { %v3124_v4 = vpop.f32.mrb[110].mxu0 }
0x3000   :  { %3940 = vtanh.f32 %v3122_v19  ;;  %v3867_v5 = vpop.f32.mrb[111].mxu0 }
0x300a   :  { %v3941_v6 = vpop.eup %3940 }
0x300b   :  { %v3128_v7 = vpack.c.bf16 %v3941_v6, %v3941_v6 }
0x300d   :  { %3873 = vmatmul.mubr.msk.bf16.vlgmr.msra.gmra.mrb[108].mxu1 %vm185_vm3, %v3128_v7 }
0x30e0   :  { %v3166_v8 = vpop.f32.mrb[108].mxu1 }
0x30e1   :  { %v3167_v9 = vadd.f32 %v4502_v22, %v3166_v8  ;;  %v3874_v11 = vpop.f32.mrb[109].mxu1 }
0x30e2   :  { %v3169_v12 = vpop.f32.mrb[110].mxu1 }
0x30e3   :  { %v3172_v32 = vmul.f32 %v3334_v37, %v3167_v9  ;;  %v3875_v13 = vpop.f32.mrb[111].mxu1 }
0x30e5   :  { %v3173_v14 = vadd.f32 %v3172_v32, %v3080_v18 }
0x30e7   :  { %v3175_v15 = vcombine.high %v3173_v14, %v3173_v14  ;;  %v3182_v16 = vrot.slane %v3173_v14, %v4035_v10 }
0x30e9   :  { %v3189_v0 = vrot.slane %v3175_v15, %v4035_v10  ;;  %v3190_v38 = vcombine.high %v3182_v16, %v3182_v16  ;;  %v3198_v17 = vrot.slane %v3182_v16, %v4035_v10 }
0x30eb   :  { %v3191_v20 = vcombine.high %v3189_v0, %v3189_v0  ;;  %v3205_v21 = vrot.slane %v3189_v0, %v4035_v10  ;;  %v3212_v26 = vrot.slane %v3190_v38, %v4035_v10  ;;  %v3220_v27 = vcombine.high %v3198_v17, %v3198_v17  ;;  %3232 = vst.msk [vmem:[#allocation2 + $0x7] sm:$0x1] %vm104_vm2, %v3198_v17 }
0x30ed   :  { %v3219_v22 = vrot.slane %v3191_v20, %v4035_v10  ;;  %v3221_v29 = vcombine.high %v3205_v21, %v3205_v21  ;;  %v3222_v30 = vcombine.high %v3212_v26, %v3212_v26  ;;  %3233 = vst.msk [vmem:[#allocation2 + $0xf] sm:$0x1] %vm104_vm2, %v3212_v26  ;;  %3234 = vst.msk [vmem:[#allocation2 + $0x17] sm:$0x1] %vm104_vm2, %v3220_v27 }
0x30ee   :  { %3236 = vst.msk [vmem:[#allocation2 + $0x27] sm:$0x1] %vm104_vm2, %v3205_v21 }
0x30ef   :  { %v3223_v31 = vcombine.high %v3219_v22, %v3219_v22  ;;  %3235 = vst.msk [vmem:[#allocation2 + $0x1f] sm:$0x1] %vm104_vm2, %v3222_v30  ;;  %3237 = vst.msk [vmem:[#allocation2 + $0x2f] sm:$0x1] %vm104_vm2, %v3219_v22 }
0x30f0   :  { %3238 = vst.msk [vmem:[#allocation2 + $0x37] sm:$0x1] %vm104_vm2, %v3221_v29 }
0x30f1   :  { %3239 = vst.msk [vmem:[#allocation2 + $0x3f] sm:$0x1] %vm104_vm2, %v3223_v31 }
0x30f2   :  { %3958 = shalt.err (!%p3955_p4)
}
0x30f3   :  { %s3959_s22 = scalar_lea.hbm %s4774_s6, 1024 }
0x30f4   :  { %p3960_p5 = scmp.ne.s32.totalorder %s4774_s6, %s3959_s22  ;;  %p3963_p6 = scmp.lt.u32.totalorder %s3959_s22, %s4774_s6 }
0x30f6   :  { %p3965_p7 = pnand %p3963_p6, %p3960_p5 }
0x30f8   :  { %3968 = shalt.err (!%p3965_p7)
}
0x30f9   :  { %s3975_s1 = smov 128   ;;  %s3976_s25 = smov 8  }
0x30fa   :  { %3251 = dma.vmem_to_hbm [thread:$0]  %s3246_s19, 1024, %s4774_s6, [#allocation3], %s3975_s1, %s3975_s1, %s3976_s25  }
0x30fb   :  { %3969 = dma.done.wait [#allocation3], 1024  }
0x30fc   :  { %3970 = vsyncadd [#allocation3], 4294966272 }
0x30fd   :  { %3255 = vsyncpa [#allocation3], 1 }

</bundles_post_ra>
